<compile_context>
chip_gen: v7x
topology: tpu7x:2x2x1
jax: 0.10.0
libtpu: 0.0.40
codegen_flags: <defaults>
</compile_context>

<pallas_src>
import functools
import math

import jax
import jax.numpy as jnp
from jax.experimental import pallas as pl
from jax.experimental.pallas import tpu as pltpu


_LN_EPS = 1e-12                  # BERT layer_norm_eps (stats kept in f32)


def _pick_vmem_limit():
    """Generation-aware scoped-VMEM cap (v7x has 64 MiB physical, v5e/v6e 128)."""
    try:
        cap = pltpu.get_tpu_info().vmem_capacity_bytes
    except Exception:
        return 48 * 1024 * 1024
    if cap <= 64 * 1024 * 1024:
        return 56 * 1024 * 1024
    return 100 * 1024 * 1024


_VMEM_LIMIT = _pick_vmem_limit()


# ----------------------------- tiling helpers ------------------------------

def _round_up(x, m):
    return ((x + m - 1) // m) * m


def _choose_tile(dim, target, align):
    """Largest tile <= target, multiple of `align`, dividing round_up(dim, align)."""
    dim_p = _round_up(dim, align)
    t = min(_round_up(target, align), dim_p)
    while dim_p % t:
        t -= align
    return t, dim_p


def _pad2(a, rows, cols):
    r, c = a.shape
    if r == rows and c == cols:
        return a
    return jnp.pad(a, ((0, rows - r), (0, cols - c)))


# ----------------------------- Pallas kernels ------------------------------

def _linear_kernel(x_ref, w_ref, b_ref, o_ref, acc_ref, *, activation):
    """Tiled  x @ w + b  (optionally GELU).  Grid = (M/tm, N/tn, K/tk).
    x/w bf16, f32 accumulator, bf16 output."""
    @pl.when(pl.program_id(2) == 0)
    def _():
        acc_ref[...] = jnp.zeros_like(acc_ref)

    acc_ref[...] += jnp.dot(x_ref[...], w_ref[...],
                            preferred_element_type=jnp.float32)

    @pl.when(pl.program_id(2) == pl.num_programs(2) - 1)
    def _():
        y = acc_ref[...] + b_ref[...]
        if activation == "gelu":
            # TODO(synk): PyTorch BERT uses exact erf-GELU; tanh approximation used
            # here (Mosaic-safe transcendental, numerically very close).
            y = jax.nn.gelu(y, approximate=True)
        o_ref[...] = y.astype(o_ref.dtype)


def _linear_add_ln_kernel(x_ref, w_ref, b_ref, r_ref, g_ref, beta_ref,
                          o_ref, acc_ref):
    """Fused  LayerNorm(x @ w + b + residual).  Grid = (M/tm, K/tk), full-H lanes."""
    @pl.when(pl.program_id(1) == 0)
    def _():
        acc_ref[...] = jnp.zeros_like(acc_ref)

    acc_ref[...] += jnp.dot(x_ref[...], w_ref[...],
                            preferred_element_type=jnp.float32)

    @pl.when(pl.program_id(1) == pl.num_programs(1) - 1)
    def _():
        y = acc_ref[...] + b_ref[...] + r_ref[...].astype(jnp.float32)
        mu = jnp.mean(y, axis=-1, keepdims=True)
        var = jnp.mean(jnp.square(y - mu), axis=-1, keepdims=True)
        inv = jax.lax.rsqrt(var + _LN_EPS)
        o_ref[...] = ((y - mu) * inv * g_ref[...] + beta_ref[...]).astype(o_ref.dtype)


def _ln_kernel(x_ref, g_ref, b_ref, o_ref):
    """Plain row-tiled LayerNorm (embeddings) — f32 stats, bf16 output."""
    x = x_ref[...]
    mu = jnp.mean(x, axis=-1, keepdims=True)
    var = jnp.mean(jnp.square(x - mu), axis=-1, keepdims=True)
    inv = jax.lax.rsqrt(var + _LN_EPS)
    o_ref[...] = ((x - mu) * inv * g_ref[...] + b_ref[...]).astype(o_ref.dtype)


def _attention_kernel(hm_ref, q_ref, kv_ref, bias_ref, o_ref, *,
                      num_heads, head_dim, hidden, heads_per_group):
    """One (batch, query-tile) grid step.

    hm_ref  : (num_heads,) f32 head mask, SMEM scalars
    q_ref   : (1, tq, 3H) bf16  query rows of the fused QKV activation
    kv_ref  : (1, S, 3H)  bf16  full-sequence fused QKV (K/V thirds used)
    bias_ref: (1, 1, S)   f32   additive padding-mask bias (0 / -10000)
    o_ref   : (1, tq, H)  bf16  context, written lane-dense per head group

    Heads are processed in 128-lane groups (pairs when head_dim == 64): one
    wide slab load per group, per-head slices are static offsets inside the
    loaded values, and one wide store per group.
    """
    bias = bias_ref[0]                                          # (1, S) f32
    G = heads_per_group * head_dim
    for g0 in range(0, num_heads, heads_per_group):
        c0 = g0 * head_dim
        q_slab = q_ref[0, :, c0:c0 + G]                                  # (tq, G)
        k_slab = kv_ref[0, :, hidden + c0:hidden + c0 + G]               # (S, G)
        v_slab = kv_ref[0, :, 2 * hidden + c0:2 * hidden + c0 + G]       # (S, G)
        ctxs = []
        for s_ in range(heads_per_group):
            h = g0 + s_
            lo = s_ * head_dim
            q = q_slab[:, lo:lo + head_dim]
            k = k_slab[:, lo:lo + head_dim]
            v = v_slab[:, lo:lo + head_dim]
            # 1/sqrt(dh) scale is folded into the Q projection weights at init.
            s = jax.lax.dot_general(q, k, (((1,), (1,)), ((), ())),
                                    preferred_element_type=jnp.float32)   # (tq, S)
            s = s + bias
            m = jnp.max(s, axis=-1, keepdims=True)
            p = jnp.exp(s - m)
            l = jnp.sum(p, axis=-1, keepdims=True)
            ctx = jax.lax.dot_general(p.astype(jnp.bfloat16), v,
                                      (((1,), (0,)), ((), ())),
                                      preferred_element_type=jnp.float32)  # (tq, dh)
            # deferred softmax normalization + HF-style head_mask, applied to the
            # (tq, dh) context instead of the (tq, S) probs; divide on the EUP slot.
            ctx = ctx * (hm_ref[h] * pl.reciprocal(l, approx=True))
            ctxs.append(ctx)
        grp = ctxs[0] if len(ctxs) == 1 else jnp.concatenate(ctxs, axis=-1)
        o_ref[0, :, c0:c0 + G] = grp.astype(o_ref.dtype)


# ----------------------------- kernel wrappers ------------------------------

def linear(x, w, b, *, activation=None, out_dtype=jnp.bfloat16,
           tm=512, tn=1024, tk=512):
    """Tiled x:(M,K) @ w:(K,N) + b -> (M,N), bf16 operands, f32 accumulate."""
    M, K = x.shape
    _, N = w.shape
    tm, Mp = _choose_tile(M, tm, 16)
    tn, Np = _choose_tile(N, tn, 128)
    tk, Kp = _choose_tile(K, tk, 128)

    xp = _pad2(x.astype(jnp.bfloat16), Mp, Kp)
    wp = _pad2(w.astype(jnp.bfloat16), Kp, Np)
    bp = _pad2(b.reshape(1, N).astype(jnp.float32), 1, Np)

    out = pl.pallas_call(
        functools.partial(_linear_kernel, activation=activation),
        grid=(Mp // tm, Np // tn, Kp // tk),
        in_specs=[
            pl.BlockSpec((tm, tk), lambda i, j, k: (i, k)),
            pl.BlockSpec((tk, tn), lambda i, j, k: (k, j)),
            pl.BlockSpec((1, tn), lambda i, j, k: (0, j)),
        ],
        out_specs=pl.BlockSpec((tm, tn), lambda i, j, k: (i, j)),
        out_shape=jax.ShapeDtypeStruct((Mp, Np), out_dtype),
        scratch_shapes=[pltpu.VMEM((tm, tn), jnp.float32)],
        compiler_params=pltpu.CompilerParams(
            dimension_semantics=("parallel", "parallel", "arbitrary"),
            vmem_limit_bytes=_VMEM_LIMIT),
    )(xp, wp, bp)
    if (Mp, Np) != (M, N):
        out = out[:M, :N]
    return out


def linear_add_ln(x, w, b, residual, gamma, beta, *, out_dtype=jnp.bfloat16,
                  tm=512, tk=512):
    """Fused LayerNorm(x @ w + b + residual) over the last dim (N = full width)."""
    M, K = x.shape
    _, N = w.shape
    tm, Mp = _choose_tile(M, tm, 16)
    tk, Kp = _choose_tile(K, tk, 128)

    xp = _pad2(x.astype(jnp.bfloat16), Mp, Kp)
    wp = _pad2(w.astype(jnp.bfloat16), Kp, N)
    rp = _pad2(residual.astype(jnp.bfloat16), Mp, N)

    out = pl.pallas_call(
        _linear_add_ln_kernel,
        grid=(Mp // tm, Kp // tk),
        in_specs=[
            pl.BlockSpec((tm, tk), lambda i, k: (i, k)),
            pl.BlockSpec((tk, N), lambda i, k: (k, 0)),
            pl.BlockSpec((1, N), lambda i, k: (0, 0)),
            pl.BlockSpec((tm, N), lambda i, k: (i, 0)),
            pl.BlockSpec((1, N), lambda i, k: (0, 0)),
            pl.BlockSpec((1, N), lambda i, k: (0, 0)),
        ],
        out_specs=pl.BlockSpec((tm, N), lambda i, k: (i, 0)),
        out_shape=jax.ShapeDtypeStruct((Mp, N), out_dtype),
        scratch_shapes=[pltpu.VMEM((tm, N), jnp.float32)],
        compiler_params=pltpu.CompilerParams(
            dimension_semantics=("parallel", "arbitrary"),
            vmem_limit_bytes=_VMEM_LIMIT),
    )(xp, wp, b.reshape(1, N).astype(jnp.float32), rp,
      gamma.reshape(1, N).astype(jnp.float32),
      beta.reshape(1, N).astype(jnp.float32))
    return out[:M] if Mp != M else out


def layer_norm(x, gamma, beta, *, out_dtype=jnp.bfloat16, tm=512):
    """Row-tiled LayerNorm over last dim.  x: (M, H) f32 -> (M, H) bf16."""
    M, H = x.shape
    tm, Mp = _choose_tile(M, tm, 16)
    xp = x if Mp == M else jnp.pad(x, ((0, Mp - M), (0, 0)))
    out = pl.pallas_call(
        _ln_kernel,
        grid=(Mp // tm,),
        in_specs=[
            pl.BlockSpec((tm, H), lambda i: (i, 0)),
            pl.BlockSpec((1, H), lambda i: (0, 0)),
            pl.BlockSpec((1, H), lambda i: (0, 0)),
        ],
        out_specs=pl.BlockSpec((tm, H), lambda i: (i, 0)),
        out_shape=jax.ShapeDtypeStruct((Mp, H), out_dtype),
        compiler_params=pltpu.CompilerParams(
            dimension_semantics=("parallel",),
            vmem_limit_bytes=_VMEM_LIMIT),
    )(xp, gamma.reshape(1, H).astype(jnp.float32),
      beta.reshape(1, H).astype(jnp.float32))
    return out[:M] if Mp != M else out


def attention(qkv, mask_bias, head_mask, *, num_heads):
    """qkv: (B, S, 3H) bf16; mask_bias: (B, 1, S) f32; head_mask: (nh,) -> (B, S, H) bf16."""
    B, S, H3 = qkv.shape
    H = H3 // 3
    dh = H // num_heads

    # Head-group width: smallest divisor of num_heads giving a 128-lane slab
    # (pairs at dh=64 for BERT-base); fall back to all heads for tiny configs.
    g = num_heads
    for cand in range(1, num_heads):
        if num_heads % cand == 0 and (cand * dh) % 128 == 0:
            g = cand
            break

    # Query-row tiles: second parallel grid axis (megacore / v7x load balance).
    # K/V keep full S; their block index is constant over the query axis so the
    # slab is only DMA'd once per batch element.
    tq = S
    for cand in (256, 128):
        if S % cand == 0:
            tq = cand
            break

    return pl.pallas_call(
        functools.partial(_attention_kernel, num_heads=num_heads, head_dim=dh,
                          hidden=H, heads_per_group=g),
        grid=(B, S // tq),
        in_specs=[
            pl.BlockSpec(memory_space=pltpu.MemorySpace.SMEM),       # head_mask scalars
            pl.BlockSpec((1, tq, H3), lambda b, qi: (b, qi, 0)),     # Q rows (fused QKV)
            pl.BlockSpec((1, S, H3), lambda b, qi: (b, 0, 0)),       # full-S fused QKV
            pl.BlockSpec((1, 1, S), lambda b, qi: (b, 0, 0)),        # additive mask bias
        ],
        out_specs=pl.BlockSpec((1, tq, H), lambda b, qi: (b, qi, 0)),
        out_shape=jax.ShapeDtypeStruct((B, S, H), jnp.bfloat16),
        compiler_params=pltpu.CompilerParams(
            dimension_semantics=("parallel", "parallel"),
            vmem_limit_bytes=_VMEM_LIMIT),
    )(head_mask.astype(jnp.float32), qkv, qkv, mask_bias)


# ----------------------------- parameters ----------------------------------

class _KeyGen:
    def __init__(self, key):
        self._key = key
        self._i = 0

    def __call__(self):
        self._i += 1
        return jax.random.fold_in(self._key, self._i)


def init_params(key, *, vocab, hidden, num_layers, num_heads, inter,
                max_pos, num_labels):
    kg = _KeyGen(key)
    head_dim = hidden // num_heads
    scale = 1.0 / math.sqrt(head_dim)

    def rnd(shape):
        return 0.02 * jax.random.normal(kg(), shape, jnp.float32)

    zeros = lambda shape: jnp.zeros(shape, jnp.float32)
    ones = lambda shape: jnp.ones(shape, jnp.float32)

    params = {
        "word_emb": rnd((vocab, hidden)),
        "pos_emb": rnd((max_pos, hidden)),
        "type_emb": rnd((2, hidden)),
        "emb_ln_g": ones((hidden,)), "emb_ln_b": zeros((hidden,)),
        # classifier head stays f32 and runs in plain JAX (too tiny for Pallas)
        "classifier_w": rnd((hidden, num_labels)),
        "classifier_b": zeros((num_labels,)),
        "layers": [],
    }
    for _ in range(num_layers):
        # Q/K/V fused into one (H, 3H) projection; the 1/sqrt(dh) softmax scale
        # is folded into the Q columns (and would apply to the Q bias too).
        qkv_w = rnd((hidden, 3 * hidden)).at[:, :hidden].multiply(scale)
        qkv_b = zeros((3 * hidden,)).at[:hidden].multiply(scale)
        params["layers"].append({
            "qkv_w": qkv_w.astype(jnp.bfloat16), "qkv_b": qkv_b,
            "attn_out_w": rnd((hidden, hidden)).astype(jnp.bfloat16),
            "attn_out_b": zeros((hidden,)),
            "attn_ln_g": ones((hidden,)), "attn_ln_b": zeros((hidden,)),
            "inter_w": rnd((hidden, inter)).astype(jnp.bfloat16),
            "inter_b": zeros((inter,)),
            "out_w": rnd((inter, hidden)).astype(jnp.bfloat16),
            "out_b": zeros((hidden,)),
            "out_ln_g": ones((hidden,)), "out_ln_b": zeros((hidden,)),
        })
    return params


# ----------------------------- forward --------------------------------------

def sa_linear_model_prune_forward(params, input_ids, head_mask=None, *, num_heads):
    B, S = input_ids.shape
    H = params["word_emb"].shape[1]
    nh = num_heads
    L = len(params["layers"])

    # attention_mask = zeros_like(input_ids); attention_mask[input_ids != 0] = 1
    attention_mask = (input_ids != 0).astype(jnp.float32)
    # BERT extended attention mask: (1 - mask) * -10000, broadcast over heads/queries.
    mask_bias = ((1.0 - attention_mask) * -10000.0).reshape(B, 1, S)

    if head_mask is None:
        head_mask = jnp.ones((L, nh), dtype=jnp.float32)

    # Embeddings (gathers are plain-JAX glue); LayerNorm in Pallas (bf16 out).
    x = (params["word_emb"][input_ids]
         + params["pos_emb"][:S][None, :, :]
         + params["type_emb"][0][None, None, :])
    h = layer_norm(x.reshape(B * S, H), params["emb_ln_g"], params["emb_ln_b"])
    # embedding / hidden / attention-prob dropout: inference mode -> identity

    for li, lp in enumerate(params["layers"]):
        # --- self attention (fused QKV matmul, lane-dense context output) ---
        qkv = linear(h, lp["qkv_w"], lp["qkv_b"])                    # (B*S, 3H) bf16
        ctx = attention(qkv.reshape(B, S, 3 * H), mask_bias,
                        head_mask[li], num_heads=nh)                 # (B, S, H) bf16
        # fused: out-proj + residual + LayerNorm
        h = linear_add_ln(ctx.reshape(B * S, H),
                          lp["attn_out_w"], lp["attn_out_b"],
                          h, lp["attn_ln_g"], lp["attn_ln_b"])

        # --- feed forward ---
        inter = linear(h, lp["inter_w"], lp["inter_b"], activation="gelu")
        h = linear_add_ln(inter, lp["out_w"], lp["out_b"],
                          h, lp["out_ln_g"], lp["out_ln_b"])

    # sequence_output[:, 0, :]  (CLS token)
    cls = h.reshape(B, S, H)[:, 0, :]
    # self.dropout(sequence_output): inference mode -> identity
    # classifier is (B,H)x(H,num_labels): plain JAX, not worth a Pallas launch.
    logits = (jnp.dot(cls.astype(jnp.float32), params["classifier_w"])
              + params["classifier_b"])
    return logits


# ----------------------------- main ------------------------------------------

if __name__ == "__main__":
    VOCAB, HIDDEN, LAYERS, HEADS = 100, 32, 2, 4
    INTER, MAX_POS, NUM_LABELS = 64, 64, 2
    B, S = 2, 8

    key = jax.random.PRNGKey(0)
    params = init_params(
        jax.random.fold_in(key, 0),
        vocab=VOCAB, hidden=HIDDEN, num_layers=LAYERS, num_heads=HEADS,
        inter=INTER, max_pos=MAX_POS, num_labels=NUM_LABELS)

    input_ids = jax.random.randint(
        jax.random.fold_in(key, 1), (B, S), 1, VOCAB, dtype=jnp.int32)
    # add some padding tokens (id 0) so attention_mask construction is exercised
    input_ids = input_ids.at[:, -2:].set(0)

    fwd = jax.jit(functools.partial(sa_linear_model_prune_forward,
                                    num_heads=HEADS))
    logits = fwd(params, input_ids)
    jax.block_until_ready(logits)

    assert logits.shape == (B, NUM_LABELS)
    assert logits.dtype == jnp.float32
    assert bool(jnp.all(jnp.isfinite(logits)))
    print("KERNEL_OK")
</pallas_src>

<mosaic_0001>
module attributes {stable_mosaic.version = 11 : i64} {
  func.func @_ln_kernel(%arg0: i32, %arg1: memref<16x32xf32, #tpu.memory_space<vmem>>, %arg2: memref<1x32xf32, #tpu.memory_space<vmem>>, %arg3: memref<1x32xf32, #tpu.memory_space<vmem>>, %arg4: memref<16x32xbf16, #tpu.memory_space<vmem>>) attributes {dimension_semantics = [#tpu.dimension_semantics<parallel>], iteration_bounds = array<i64: 1>, scalar_prefetch = 0 : i64, scratch_operands = 0 : i64, tpu.core_type = #tpu.core_type<tc>, window_params = [{transform_indices = @transform_0, window_bounds = array<i64: 16, 32>}, {pipeline_mode = #tpu.pipeline_mode<synchronous>, transform_indices = @transform_1, window_bounds = array<i64: 1, 32>}, {pipeline_mode = #tpu.pipeline_mode<synchronous>, transform_indices = @transform_2, window_bounds = array<i64: 1, 32>}, {transform_indices = @transform_3, window_bounds = array<i64: 16, 32>}]} {
    %c0 = arith.constant 0 : index
    %c0_0 = arith.constant 0 : index
    %0 = vector.load %arg1[%c0, %c0_0] : memref<16x32xf32, #tpu.memory_space<vmem>>, vector<16x32xf32>
    %cst = arith.constant dense<0.000000e+00> : vector<16xf32>
    %1 = vector.multi_reduction <add>, %0, %cst [1] : vector<16x32xf32> to vector<16xf32>
    %2 = vector.shape_cast %1 : vector<16xf32> to vector<16x1xf32>
    %cst_1 = arith.constant 3.200000e+01 : f32
    %3 = vector.broadcast %cst_1 : f32 to vector<16x1xf32>
    %4 = arith.divf %2, %3 : vector<16x1xf32>
    %5 = vector.broadcast %4 : vector<16x1xf32> to vector<16x32xf32>
    %6 = arith.subf %0, %5 : vector<16x32xf32>
    %7 = arith.mulf %6, %6 : vector<16x32xf32>
    %cst_2 = arith.constant dense<0.000000e+00> : vector<16xf32>
    %8 = vector.multi_reduction <add>, %7, %cst_2 [1] : vector<16x32xf32> to vector<16xf32>
    %9 = vector.shape_cast %8 : vector<16xf32> to vector<16x1xf32>
    %cst_3 = arith.constant 3.200000e+01 : f32
    %10 = vector.broadcast %cst_3 : f32 to vector<16x1xf32>
    %11 = arith.divf %9, %10 : vector<16x1xf32>
    %cst_4 = arith.constant 9.99999996E-13 : f32
    %12 = vector.broadcast %cst_4 : f32 to vector<16x1xf32>
    %13 = arith.addf %11, %12 : vector<16x1xf32>
    %14 = math.rsqrt %13 : vector<16x1xf32>
    %15 = vector.broadcast %4 : vector<16x1xf32> to vector<16x32xf32>
    %16 = arith.subf %0, %15 : vector<16x32xf32>
    %17 = vector.broadcast %14 : vector<16x1xf32> to vector<16x32xf32>
    %18 = arith.mulf %16, %17 : vector<16x32xf32>
    %c0_5 = arith.constant 0 : index
    %c0_6 = arith.constant 0 : index
    %19 = vector.load %arg2[%c0_5, %c0_6] : memref<1x32xf32, #tpu.memory_space<vmem>>, vector<1x32xf32>
    %20 = vector.broadcast %19 : vector<1x32xf32> to vector<16x32xf32>
    %21 = arith.mulf %18, %20 : vector<16x32xf32>
    %c0_7 = arith.constant 0 : index
    %c0_8 = arith.constant 0 : index
    %22 = vector.load %arg3[%c0_7, %c0_8] : memref<1x32xf32, #tpu.memory_space<vmem>>, vector<1x32xf32>
    %23 = vector.broadcast %22 : vector<1x32xf32> to vector<16x32xf32>
    %24 = arith.addf %21, %23 : vector<16x32xf32>
    %25 = arith.truncf %24 : vector<16x32xf32> to vector<16x32xbf16>
    %c0_9 = arith.constant 0 : index
    %c0_10 = arith.constant 0 : index
    %26 = vector.load %arg4[%c0_9, %c0_10] : memref<16x32xbf16, #tpu.memory_space<vmem>>, vector<16x32xbf16>
    tpu.vector_store %arg4[%c0_9, %c0_10], %25 {strides = array<i32>} : memref<16x32xbf16, #tpu.memory_space<vmem>>, vector<16x32xbf16>,
    return
  }
  func.func @transform_0(%arg0: i32) -> (i32, i32) {
    %c0_i32 = arith.constant 0 : i32
    %c0_i32_0 = arith.constant 0 : i32
    return %arg0, %c0_i32 : i32, i32
  }
  func.func @transform_1(%arg0: i32) -> (i32, i32) {
    %c0_i32 = arith.constant 0 : i32
    %c0_i32_0 = arith.constant 0 : i32
    %c0_i32_1 = arith.constant 0 : i32
    return %c0_i32, %c0_i32_0 : i32, i32
  }
  func.func @transform_2(%arg0: i32) -> (i32, i32) {
    %c0_i32 = arith.constant 0 : i32
    %c0_i32_0 = arith.constant 0 : i32
    %c0_i32_1 = arith.constant 0 : i32
    return %c0_i32, %c0_i32_0 : i32, i32
  }
  func.func @transform_3(%arg0: i32) -> (i32, i32) {
    %c0_i32 = arith.constant 0 : i32
    %c0_i32_0 = arith.constant 0 : i32
    return %arg0, %c0_i32 : i32, i32
  }
}

module attributes {stable_mosaic.version = 11 : i64} {
  func.func @_linear_kernel(%arg0: i32, %arg1: i32, %arg2: i32, %arg3: memref<16x128xbf16, #tpu.memory_space<vmem>>, %arg4: memref<128x128xbf16, #tpu.memory_space<vmem>>, %arg5: memref<1x128xf32, #tpu.memory_space<vmem>>, %arg6: memref<16x128xbf16, #tpu.memory_space<vmem>>, %arg7: memref<16x128xf32, #tpu.memory_space<vmem>>) attributes {dimension_semantics = [#tpu.dimension_semantics<parallel>, #tpu.dimension_semantics<parallel>, #tpu.dimension_semantics<arbitrary>], iteration_bounds = array<i64: 1, 1, 1>, scalar_prefetch = 0 : i64, scratch_operands = 1 : i64, tpu.core_type = #tpu.core_type<tc>, window_params = [{transform_indices = @transform_0, window_bounds = array<i64: 16, 128>}, {transform_indices = @transform_1, window_bounds = array<i64: 128, 128>}, {transform_indices = @transform_2, window_bounds = array<i64: 1, 128>}, {transform_indices = @transform_3, window_bounds = array<i64: 16, 128>}]} {
    %c0_i32 = arith.constant 0 : i32
    %0 = arith.cmpi eq, %arg2, %c0_i32 : i32
    %1 = arith.extui %0 : i1 to i32
    %c0_i32_0 = arith.constant 0 : i32
    %2 = arith.cmpi ne, %1, %c0_i32_0 : i32
    scf.if %2 {
      %cst_10 = arith.constant 0.000000e+00 : f32
      %12 = vector.broadcast %cst_10 : f32 to vector<16x128xf32>
      %c0_11 = arith.constant 0 : index
      %c0_12 = arith.constant 0 : index
      %13 = vector.load %arg7[%c0_11, %c0_12] : memref<16x128xf32, #tpu.memory_space<vmem>>, vector<16x128xf32>
      tpu.vector_store %arg7[%c0_11, %c0_12], %12 {strides = array<i32>} : memref<16x128xf32, #tpu.memory_space<vmem>>, vector<16x128xf32>,
    } else {
    }
    %c0 = arith.constant 0 : index
    %c0_1 = arith.constant 0 : index
    %3 = vector.load %arg7[%c0, %c0_1] : memref<16x128xf32, #tpu.memory_space<vmem>>, vector<16x128xf32>
    %c0_2 = arith.constant 0 : index
    %c0_3 = arith.constant 0 : index
    %4 = vector.load %arg3[%c0_2, %c0_3] : memref<16x128xbf16, #tpu.memory_space<vmem>>, vector<16x128xbf16>
    %c0_4 = arith.constant 0 : index
    %c0_5 = arith.constant 0 : index
    %5 = vector.load %arg4[%c0_4, %c0_5] : memref<128x128xbf16, #tpu.memory_space<vmem>>, vector<128x128xbf16>
    %cst = arith.constant dense<0.000000e+00> : vector<16x128xf32>
    %6 = tpu.matmul %4, %5, %cst {dimension_numbers = #tpu.dot_dimension_numbers<[1], [0], [0], [1], [0, 0, 1, 1], [], []>} : vector<16x128xbf16>, vector<128x128xbf16>, vector<16x128xf32> -> vector<16x128xf32>
    %7 = arith.addf %3, %6 : vector<16x128xf32>
    %c0_6 = arith.constant 0 : index
    %c0_7 = arith.constant 0 : index
    %8 = vector.load %arg7[%c0_6, %c0_7] : memref<16x128xf32, #tpu.memory_space<vmem>>, vector<16x128xf32>
    tpu.vector_store %arg7[%c0_6, %c0_7], %7 {strides = array<i32>} : memref<16x128xf32, #tpu.memory_space<vmem>>, vector<16x128xf32>,
    %c0_i32_8 = arith.constant 0 : i32
    %9 = arith.cmpi eq, %arg2, %c0_i32_8 : i32
    %10 = arith.extui %9 : i1 to i32
    %c0_i32_9 = arith.constant 0 : i32
    %11 = arith.cmpi ne, %10, %c0_i32_9 : i32
    scf.if %11 {
      %c0_10 = arith.constant 0 : index
      %c0_11 = arith.constant 0 : index
      %12 = vector.load %arg7[%c0_10, %c0_11] : memref<16x128xf32, #tpu.memory_space<vmem>>, vector<16x128xf32>
      %c0_12 = arith.constant 0 : index
      %c0_13 = arith.constant 0 : index
      %13 = vector.load %arg5[%c0_12, %c0_13] : memref<1x128xf32, #tpu.memory_space<vmem>>, vector<1x128xf32>
      %14 = vector.broadcast %13 : vector<1x128xf32> to vector<16x128xf32>
      %15 = arith.addf %12, %14 : vector<16x128xf32>
      %16 = arith.truncf %15 : vector<16x128xf32> to vector<16x128xbf16>
      %c0_14 = arith.constant 0 : index
      %c0_15 = arith.constant 0 : index
      %17 = vector.load %arg6[%c0_14, %c0_15] : memref<16x128xbf16, #tpu.memory_space<vmem>>, vector<16x128xbf16>
      tpu.vector_store %arg6[%c0_14, %c0_15], %16 {strides = array<i32>} : memref<16x128xbf16, #tpu.memory_space<vmem>>, vector<16x128xbf16>,
    } else {
    }
    return
  }
  func.func @transform_0(%arg0: i32, %arg1: i32, %arg2: i32) -> (i32, i32) {
    %c0_i32 = arith.constant 0 : i32
    return %arg0, %arg2 : i32, i32
  }
  func.func @transform_1(%arg0: i32, %arg1: i32, %arg2: i32) -> (i32, i32) {
    %c0_i32 = arith.constant 0 : i32
    return %arg2, %arg1 : i32, i32
  }
  func.func @transform_2(%arg0: i32, %arg1: i32, %arg2: i32) -> (i32, i32) {
    %c0_i32 = arith.constant 0 : i32
    %c0_i32_0 = arith.constant 0 : i32
    return %c0_i32, %arg1 : i32, i32
  }
  func.func @transform_3(%arg0: i32, %arg1: i32, %arg2: i32) -> (i32, i32) {
    %c0_i32 = arith.constant 0 : i32
    return %arg0, %arg1 : i32, i32
  }
}

module attributes {stable_mosaic.version = 11 : i64} {
  func.func @_attention_kernel(%arg0: i32, %arg1: i32, %arg2: memref<4xf32, #tpu.memory_space<smem>>, %arg3: memref<1x8x96xbf16, #tpu.memory_space<vmem>>, %arg4: memref<1x8x96xbf16, #tpu.memory_space<vmem>>, %arg5: memref<1x1x8xf32, #tpu.memory_space<vmem>>, %arg6: memref<1x8x32xbf16, #tpu.memory_space<vmem>>) attributes {dimension_semantics = [#tpu.dimension_semantics<parallel>, #tpu.dimension_semantics<parallel>], iteration_bounds = array<i64: 2, 1>, scalar_prefetch = 0 : i64, scratch_operands = 0 : i64, tpu.core_type = #tpu.core_type<tc>, window_params = [{transform_indices = @transform_0, window_bounds = array<i64: 4>}, {transform_indices = @transform_1, window_bounds = array<i64: 1, 8, 96>}, {transform_indices = @transform_2, window_bounds = array<i64: 1, 8, 96>}, {transform_indices = @transform_3, window_bounds = array<i64: 1, 1, 8>}, {transform_indices = @transform_4, window_bounds = array<i64: 1, 8, 32>}]} {
    %c0 = arith.constant 0 : index
    %c0_0 = arith.constant 0 : index
    %c0_1 = arith.constant 0 : index
    %0 = vector.load %arg5[%c0, %c0_0, %c0_1] : memref<1x1x8xf32, #tpu.memory_space<vmem>>, vector<1x1x8xf32>
    %1 = vector.shape_cast %0 : vector<1x1x8xf32> to vector<1x8xf32>
    %c0_2 = arith.constant 0 : index
    %c0_3 = arith.constant 0 : index
    %c0_4 = arith.constant 0 : index
    %2 = vector.load %arg3[%c0_2, %c0_3, %c0_4] : memref<1x8x96xbf16, #tpu.memory_space<vmem>>, vector<1x8x32xbf16>
    %3 = vector.shape_cast %2 : vector<1x8x32xbf16> to vector<8x32xbf16>
    %c0_5 = arith.constant 0 : index
    %c0_6 = arith.constant 0 : index
    %c32 = arith.constant 32 : index
    %4 = vector.load %arg4[%c0_5, %c0_6, %c32] : memref<1x8x96xbf16, #tpu.memory_space<vmem>>, vector<1x8x32xbf16>
    %5 = vector.shape_cast %4 : vector<1x8x32xbf16> to vector<8x32xbf16>
    %c0_7 = arith.constant 0 : index
    %c0_8 = arith.constant 0 : index
    %c64 = arith.constant 64 : index
    %6 = vector.load %arg4[%c0_7, %c0_8, %c64] : memref<1x8x96xbf16, #tpu.memory_space<vmem>>, vector<1x8x32xbf16>
    %7 = vector.shape_cast %6 : vector<1x8x32xbf16> to vector<8x32xbf16>
    %8 = vector.extract_strided_slice %3 {offsets = [0, 0], sizes = [8, 8], strides = [1, 1]} : vector<8x32xbf16> to vector<8x8xbf16>
    %9 = vector.extract_strided_slice %5 {offsets = [0, 0], sizes = [8, 8], strides = [1, 1]} : vector<8x32xbf16> to vector<8x8xbf16>
    %10 = vector.extract_strided_slice %7 {offsets = [0, 0], sizes = [8, 8], strides = [1, 1]} : vector<8x32xbf16> to vector<8x8xbf16>
    %cst = arith.constant dense<0.000000e+00> : vector<8x8xf32>
    %11 = tpu.matmul %8, %9, %cst {dimension_numbers = #tpu.dot_dimension_numbers<[1], [1], [0], [0], [0, 0, 1, 0], [], []>} : vector<8x8xbf16>, vector<8x8xbf16>, vector<8x8xf32> -> vector<8x8xf32>
    %12 = vector.broadcast %1 : vector<1x8xf32> to vector<8x8xf32>
    %13 = arith.addf %11, %12 : vector<8x8xf32>
    %cst_9 = arith.constant dense<0xFF800000> : vector<8xf32>
    %14 = vector.multi_reduction <maximumf>, %13, %cst_9 [1] : vector<8x8xf32> to vector<8xf32>
    %15 = vector.shape_cast %14 : vector<8xf32> to vector<8x1xf32>
    %16 = vector.broadcast %15 : vector<8x1xf32> to vector<8x8xf32>
    %17 = arith.subf %13, %16 : vector<8x8xf32>
    %18 = math.exp %17 : vector<8x8xf32>
    %cst_10 = arith.constant dense<0.000000e+00> : vector<8xf32>
    %19 = vector.multi_reduction <add>, %18, %cst_10 [1] : vector<8x8xf32> to vector<8xf32>
    %20 = vector.shape_cast %19 : vector<8xf32> to vector<8x1xf32>
    %21 = arith.truncf %18 : vector<8x8xf32> to vector<8x8xbf16>
    %cst_11 = arith.constant dense<0.000000e+00> : vector<8x8xf32>
    %22 = tpu.matmul %21, %10, %cst_11 {dimension_numbers = #tpu.dot_dimension_numbers<[1], [0], [0], [1], [0, 0, 1, 1], [], []>} : vector<8x8xbf16>, vector<8x8xbf16>, vector<8x8xf32> -> vector<8x8xf32>
    %c0_12 = arith.constant 0 : index
    %23 = memref.load %arg2[%c0_12] : memref<4xf32, #tpu.memory_space<smem>>
    %24 = tpu.reciprocal %20 {approx = true} : vector<8x1xf32> -> vector<8x1xf32>
    %25 = vector.broadcast %23 : f32 to vector<8x1xf32>
    %26 = arith.mulf %25, %24 : vector<8x1xf32>
    %27 = vector.broadcast %26 : vector<8x1xf32> to vector<8x8xf32>
    %28 = arith.mulf %22, %27 : vector<8x8xf32>
    %29 = vector.extract_strided_slice %3 {offsets = [0, 8], sizes = [8, 8], strides = [1, 1]} : vector<8x32xbf16> to vector<8x8xbf16>
    %30 = vector.extract_strided_slice %5 {offsets = [0, 8], sizes = [8, 8], strides = [1, 1]} : vector<8x32xbf16> to vector<8x8xbf16>
    %31 = vector.extract_strided_slice %7 {offsets = [0, 8], sizes = [8, 8], strides = [1, 1]} : vector<8x32xbf16> to vector<8x8xbf16>
    %cst_13 = arith.constant dense<0.000000e+00> : vector<8x8xf32>
    %32 = tpu.matmul %29, %30, %cst_13 {dimension_numbers = #tpu.dot_dimension_numbers<[1], [1], [0], [0], [0, 0, 1, 0], [], []>} : vector<8x8xbf16>, vector<8x8xbf16>, vector<8x8xf32> -> vector<8x8xf32>
    %33 = vector.broadcast %1 : vector<1x8xf32> to vector<8x8xf32>
    %34 = arith.addf %32, %33 : vector<8x8xf32>
    %cst_14 = arith.constant dense<0xFF800000> : vector<8xf32>
    %35 = vector.multi_reduction <maximumf>, %34, %cst_14 [1] : vector<8x8xf32> to vector<8xf32>
    %36 = vector.shape_cast %35 : vector<8xf32> to vector<8x1xf32>
    %37 = vector.broadcast %36 : vector<8x1xf32> to vector<8x8xf32>
    %38 = arith.subf %34, %37 : vector<8x8xf32>
    %39 = math.exp %38 : vector<8x8xf32>
    %cst_15 = arith.constant dense<0.000000e+00> : vector<8xf32>
    %40 = vector.multi_reduction <add>, %39, %cst_15 [1] : vector<8x8xf32> to vector<8xf32>
    %41 = vector.shape_cast %40 : vector<8xf32> to vector<8x1xf32>
    %42 = arith.truncf %39 : vector<8x8xf32> to vector<8x8xbf16>
    %cst_16 = arith.constant dense<0.000000e+00> : vector<8x8xf32>
    %43 = tpu.matmul %42, %31, %cst_16 {dimension_numbers = #tpu.dot_dimension_numbers<[1], [0], [0], [1], [0, 0, 1, 1], [], []>} : vector<8x8xbf16>, vector<8x8xbf16>, vector<8x8xf32> -> vector<8x8xf32>
    %c1 = arith.constant 1 : index
    %44 = memref.load %arg2[%c1] : memref<4xf32, #tpu.memory_space<smem>>
    %45 = tpu.reciprocal %41 {approx = true} : vector<8x1xf32> -> vector<8x1xf32>
    %46 = vector.broadcast %44 : f32 to vector<8x1xf32>
    %47 = arith.mulf %46, %45 : vector<8x1xf32>
    %48 = vector.broadcast %47 : vector<8x1xf32> to vector<8x8xf32>
    %49 = arith.mulf %43, %48 : vector<8x8xf32>
    %50 = vector.extract_strided_slice %3 {offsets = [0, 16], sizes = [8, 8], strides = [1, 1]} : vector<8x32xbf16> to vector<8x8xbf16>
    %51 = vector.extract_strided_slice %5 {offsets = [0, 16], sizes = [8, 8], strides = [1, 1]} : vector<8x32xbf16> to vector<8x8xbf16>
    %52 = vector.extract_strided_slice %7 {offsets = [0, 16], sizes = [8, 8], strides = [1, 1]} : vector<8x32xbf16> to vector<8x8xbf16>
    %cst_17 = arith.constant dense<0.000000e+00> : vector<8x8xf32>
    %53 = tpu.matmul %50, %51, %cst_17 {dimension_numbers = #tpu.dot_dimension_numbers<[1], [1], [0], [0], [0, 0, 1, 0], [], []>} : vector<8x8xbf16>, vector<8x8xbf16>, vector<8x8xf32> -> vector<8x8xf32>
    %54 = vector.broadcast %1 : vector<1x8xf32> to vector<8x8xf32>
    %55 = arith.addf %53, %54 : vector<8x8xf32>
    %cst_18 = arith.constant dense<0xFF800000> : vector<8xf32>
    %56 = vector.multi_reduction <maximumf>, %55, %cst_18 [1] : vector<8x8xf32> to vector<8xf32>
    %57 = vector.shape_cast %56 : vector<8xf32> to vector<8x1xf32>
    %58 = vector.broadcast %57 : vector<8x1xf32> to vector<8x8xf32>
    %59 = arith.subf %55, %58 : vector<8x8xf32>
    %60 = math.exp %59 : vector<8x8xf32>
    %cst_19 = arith.constant dense<0.000000e+00> : vector<8xf32>
    %61 = vector.multi_reduction <add>, %60, %cst_19 [1] : vector<8x8xf32> to vector<8xf32>
    %62 = vector.shape_cast %61 : vector<8xf32> to vector<8x1xf32>
    %63 = arith.truncf %60 : vector<8x8xf32> to vector<8x8xbf16>
    %cst_20 = arith.constant dense<0.000000e+00> : vector<8x8xf32>
    %64 = tpu.matmul %63, %52, %cst_20 {dimension_numbers = #tpu.dot_dimension_numbers<[1], [0], [0], [1], [0, 0, 1, 1], [], []>} : vector<8x8xbf16>, vector<8x8xbf16>, vector<8x8xf32> -> vector<8x8xf32>
    %c2 = arith.constant 2 : index
    %65 = memref.load %arg2[%c2] : memref<4xf32, #tpu.memory_space<smem>>
    %66 = tpu.reciprocal %62 {approx = true} : vector<8x1xf32> -> vector<8x1xf32>
    %67 = vector.broadcast %65 : f32 to vector<8x1xf32>
    %68 = arith.mulf %67, %66 : vector<8x1xf32>
    %69 = vector.broadcast %68 : vector<8x1xf32> to vector<8x8xf32>
    %70 = arith.mulf %64, %69 : vector<8x8xf32>
    %71 = vector.extract_strided_slice %3 {offsets = [0, 24], sizes = [8, 8], strides = [1, 1]} : vector<8x32xbf16> to vector<8x8xbf16>
    %72 = vector.extract_strided_slice %5 {offsets = [0, 24], sizes = [8, 8], strides = [1, 1]} : vector<8x32xbf16> to vector<8x8xbf16>
    %73 = vector.extract_strided_slice %7 {offsets = [0, 24], sizes = [8, 8], strides = [1, 1]} : vector<8x32xbf16> to vector<8x8xbf16>
    %cst_21 = arith.constant dense<0.000000e+00> : vector<8x8xf32>
    %74 = tpu.matmul %71, %72, %cst_21 {dimension_numbers = #tpu.dot_dimension_numbers<[1], [1], [0], [0], [0, 0, 1, 0], [], []>} : vector<8x8xbf16>, vector<8x8xbf16>, vector<8x8xf32> -> vector<8x8xf32>
    %75 = vector.broadcast %1 : vector<1x8xf32> to vector<8x8xf32>
    %76 = arith.addf %74, %75 : vector<8x8xf32>
    %cst_22 = arith.constant dense<0xFF800000> : vector<8xf32>
    %77 = vector.multi_reduction <maximumf>, %76, %cst_22 [1] : vector<8x8xf32> to vector<8xf32>
    %78 = vector.shape_cast %77 : vector<8xf32> to vector<8x1xf32>
    %79 = vector.broadcast %78 : vector<8x1xf32> to vector<8x8xf32>
    %80 = arith.subf %76, %79 : vector<8x8xf32>
    %81 = math.exp %80 : vector<8x8xf32>
    %cst_23 = arith.constant dense<0.000000e+00> : vector<8xf32>
    %82 = vector.multi_reduction <add>, %81, %cst_23 [1] : vector<8x8xf32> to vector<8xf32>
    %83 = vector.shape_cast %82 : vector<8xf32> to vector<8x1xf32>
    %84 = arith.truncf %81 : vector<8x8xf32> to vector<8x8xbf16>
    %cst_24 = arith.constant dense<0.000000e+00> : vector<8x8xf32>
    %85 = tpu.matmul %84, %73, %cst_24 {dimension_numbers = #tpu.dot_dimension_numbers<[1], [0], [0], [1], [0, 0, 1, 1], [], []>} : vector<8x8xbf16>, vector<8x8xbf16>, vector<8x8xf32> -> vector<8x8xf32>
    %c3 = arith.constant 3 : index
    %86 = memref.load %arg2[%c3] : memref<4xf32, #tpu.memory_space<smem>>
    %87 = tpu.reciprocal %83 {approx = true} : vector<8x1xf32> -> vector<8x1xf32>
    %88 = vector.broadcast %86 : f32 to vector<8x1xf32>
    %89 = arith.mulf %88, %87 : vector<8x1xf32>
    %90 = vector.broadcast %89 : vector<8x1xf32> to vector<8x8xf32>
    %91 = arith.mulf %85, %90 : vector<8x8xf32>
    %92 = tpu.concatenate %28, %49, %70, %91 in 1 : vector<8x8xf32>, vector<8x8xf32>, vector<8x8xf32>, vector<8x8xf32> -> vector<8x32xf32>
    %93 = arith.truncf %92 : vector<8x32xf32> to vector<8x32xbf16>
    %c0_25 = arith.constant 0 : index
    %c0_26 = arith.constant 0 : index
    %c0_27 = arith.constant 0 : index
    %94 = vector.load %arg6[%c0_25, %c0_26, %c0_27] : memref<1x8x32xbf16, #tpu.memory_space<vmem>>, vector<1x8x32xbf16>
    %95 = vector.shape_cast %94 : vector<1x8x32xbf16> to vector<8x32xbf16>
    %96 = vector.shape_cast %93 : vector<8x32xbf16> to vector<1x8x32xbf16>
    tpu.vector_store %arg6[%c0_25, %c0_26, %c0_27], %96 {strides = array<i32>} : memref<1x8x32xbf16, #tpu.memory_space<vmem>>, vector<1x8x32xbf16>,
    return
  }
  func.func @transform_0(%arg0: i32, %arg1: i32) -> i32 {
    %c0_i32 = arith.constant 0 : i32
    %c0_i32_0 = arith.constant 0 : i32
    return %c0_i32 : i32
  }
  func.func @transform_1(%arg0: i32, %arg1: i32) -> (i32, i32, i32) {
    %c0_i32 = arith.constant 0 : i32
    %c0_i32_0 = arith.constant 0 : i32
    return %arg0, %arg1, %c0_i32 : i32, i32, i32
  }
  func.func @transform_2(%arg0: i32, %arg1: i32) -> (i32, i32, i32) {
    %c0_i32 = arith.constant 0 : i32
    %c0_i32_0 = arith.constant 0 : i32
    %c0_i32_1 = arith.constant 0 : i32
    return %arg0, %c0_i32, %c0_i32_0 : i32, i32, i32
  }
  func.func @transform_3(%arg0: i32, %arg1: i32) -> (i32, i32, i32) {
    %c0_i32 = arith.constant 0 : i32
    %c0_i32_0 = arith.constant 0 : i32
    %c0_i32_1 = arith.constant 0 : i32
    return %arg0, %c0_i32, %c0_i32_0 : i32, i32, i32
  }
  func.func @transform_4(%arg0: i32, %arg1: i32) -> (i32, i32, i32) {
    %c0_i32 = arith.constant 0 : i32
    %c0_i32_0 = arith.constant 0 : i32
    return %arg0, %arg1, %c0_i32 : i32, i32, i32
  }
}

module attributes {stable_mosaic.version = 11 : i64} {
  func.func @_linear_add_ln_kernel(%arg0: i32, %arg1: i32, %arg2: memref<16x128xbf16, #tpu.memory_space<vmem>>, %arg3: memref<128x32xbf16, #tpu.memory_space<vmem>>, %arg4: memref<1x32xf32, #tpu.memory_space<vmem>>, %arg5: memref<16x32xbf16, #tpu.memory_space<vmem>>, %arg6: memref<1x32xf32, #tpu.memory_space<vmem>>, %arg7: memref<1x32xf32, #tpu.memory_space<vmem>>, %arg8: memref<16x32xbf16, #tpu.memory_space<vmem>>, %arg9: memref<16x32xf32, #tpu.memory_space<vmem>>) attributes {dimension_semantics = [#tpu.dimension_semantics<parallel>, #tpu.dimension_semantics<arbitrary>], iteration_bounds = array<i64: 1, 1>, scalar_prefetch = 0 : i64, scratch_operands = 1 : i64, tpu.core_type = #tpu.core_type<tc>, window_params = [{transform_indices = @transform_0, window_bounds = array<i64: 16, 128>}, {transform_indices = @transform_1, window_bounds = array<i64: 128, 32>}, {pipeline_mode = #tpu.pipeline_mode<synchronous>, transform_indices = @transform_2, window_bounds = array<i64: 1, 32>}, {transform_indices = @transform_3, window_bounds = array<i64: 16, 32>}, {pipeline_mode = #tpu.pipeline_mode<synchronous>, transform_indices = @transform_4, window_bounds = array<i64: 1, 32>}, {pipeline_mode = #tpu.pipeline_mode<synchronous>, transform_indices = @transform_5, window_bounds = array<i64: 1, 32>}, {transform_indices = @transform_6, window_bounds = array<i64: 16, 32>}]} {
    %c0_i32 = arith.constant 0 : i32
    %0 = arith.cmpi eq, %arg1, %c0_i32 : i32
    %1 = arith.extui %0 : i1 to i32
    %c0_i32_0 = arith.constant 0 : i32
    %2 = arith.cmpi ne, %1, %c0_i32_0 : i32
    scf.if %2 {
      %cst_10 = arith.constant 0.000000e+00 : f32
      %12 = vector.broadcast %cst_10 : f32 to vector<16x32xf32>
      %c0_11 = arith.constant 0 : index
      %c0_12 = arith.constant 0 : index
      %13 = vector.load %arg9[%c0_11, %c0_12] : memref<16x32xf32, #tpu.memory_space<vmem>>, vector<16x32xf32>
      tpu.vector_store %arg9[%c0_11, %c0_12], %12 {strides = array<i32>} : memref<16x32xf32, #tpu.memory_space<vmem>>, vector<16x32xf32>,
    } else {
    }
    %c0 = arith.constant 0 : index
    %c0_1 = arith.constant 0 : index
    %3 = vector.load %arg9[%c0, %c0_1] : memref<16x32xf32, #tpu.memory_space<vmem>>, vector<16x32xf32>
    %c0_2 = arith.constant 0 : index
    %c0_3 = arith.constant 0 : index
    %4 = vector.load %arg2[%c0_2, %c0_3] : memref<16x128xbf16, #tpu.memory_space<vmem>>, vector<16x128xbf16>
    %c0_4 = arith.constant 0 : index
    %c0_5 = arith.constant 0 : index
    %5 = vector.load %arg3[%c0_4, %c0_5] : memref<128x32xbf16, #tpu.memory_space<vmem>>, vector<128x32xbf16>
    %cst = arith.constant dense<0.000000e+00> : vector<16x32xf32>
    %6 = tpu.matmul %4, %5, %cst {dimension_numbers = #tpu.dot_dimension_numbers<[1], [0], [0], [1], [0, 0, 1, 1], [], []>} : vector<16x128xbf16>, vector<128x32xbf16>, vector<16x32xf32> -> vector<16x32xf32>
    %7 = arith.addf %3, %6 : vector<16x32xf32>
    %c0_6 = arith.constant 0 : index
    %c0_7 = arith.constant 0 : index
    %8 = vector.load %arg9[%c0_6, %c0_7] : memref<16x32xf32, #tpu.memory_space<vmem>>, vector<16x32xf32>
    tpu.vector_store %arg9[%c0_6, %c0_7], %7 {strides = array<i32>} : memref<16x32xf32, #tpu.memory_space<vmem>>, vector<16x32xf32>,
    %c0_i32_8 = arith.constant 0 : i32
    %9 = arith.cmpi eq, %arg1, %c0_i32_8 : i32
    %10 = arith.extui %9 : i1 to i32
    %c0_i32_9 = arith.constant 0 : i32
    %11 = arith.cmpi ne, %10, %c0_i32_9 : i32
    scf.if %11 {
      %c0_10 = arith.constant 0 : index
      %c0_11 = arith.constant 0 : index
      %12 = vector.load %arg9[%c0_10, %c0_11] : memref<16x32xf32, #tpu.memory_space<vmem>>, vector<16x32xf32>
      %c0_12 = arith.constant 0 : index
      %c0_13 = arith.constant 0 : index
      %13 = vector.load %arg4[%c0_12, %c0_13] : memref<1x32xf32, #tpu.memory_space<vmem>>, vector<1x32xf32>
      %14 = vector.broadcast %13 : vector<1x32xf32> to vector<16x32xf32>
      %15 = arith.addf %12, %14 : vector<16x32xf32>
      %c0_14 = arith.constant 0 : index
      %c0_15 = arith.constant 0 : index
      %16 = vector.load %arg5[%c0_14, %c0_15] : memref<16x32xbf16, #tpu.memory_space<vmem>>, vector<16x32xbf16>
      %17 = arith.extf %16 : vector<16x32xbf16> to vector<16x32xf32>
      %18 = arith.addf %15, %17 : vector<16x32xf32>
      %cst_16 = arith.constant dense<0.000000e+00> : vector<16xf32>
      %19 = vector.multi_reduction <add>, %18, %cst_16 [1] : vector<16x32xf32> to vector<16xf32>
      %20 = vector.shape_cast %19 : vector<16xf32> to vector<16x1xf32>
      %cst_17 = arith.constant 3.200000e+01 : f32
      %21 = vector.broadcast %cst_17 : f32 to vector<16x1xf32>
      %22 = arith.divf %20, %21 : vector<16x1xf32>
      %23 = vector.broadcast %22 : vector<16x1xf32> to vector<16x32xf32>
      %24 = arith.subf %18, %23 : vector<16x32xf32>
      %25 = arith.mulf %24, %24 : vector<16x32xf32>
      %cst_18 = arith.constant dense<0.000000e+00> : vector<16xf32>
      %26 = vector.multi_reduction <add>, %25, %cst_18 [1] : vector<16x32xf32> to vector<16xf32>
      %27 = vector.shape_cast %26 : vector<16xf32> to vector<16x1xf32>
      %cst_19 = arith.constant 3.200000e+01 : f32
      %28 = vector.broadcast %cst_19 : f32 to vector<16x1xf32>
      %29 = arith.divf %27, %28 : vector<16x1xf32>
      %cst_20 = arith.constant 9.99999996E-13 : f32
      %30 = vector.broadcast %cst_20 : f32 to vector<16x1xf32>
      %31 = arith.addf %29, %30 : vector<16x1xf32>
      %32 = math.rsqrt %31 : vector<16x1xf32>
      %33 = vector.broadcast %22 : vector<16x1xf32> to vector<16x32xf32>
      %34 = arith.subf %18, %33 : vector<16x32xf32>
      %35 = vector.broadcast %32 : vector<16x1xf32> to vector<16x32xf32>
      %36 = arith.mulf %34, %35 : vector<16x32xf32>
      %c0_21 = arith.constant 0 : index
      %c0_22 = arith.constant 0 : index
      %37 = vector.load %arg6[%c0_21, %c0_22] : memref<1x32xf32, #tpu.memory_space<vmem>>, vector<1x32xf32>
      %38 = vector.broadcast %37 : vector<1x32xf32> to vector<16x32xf32>
      %39 = arith.mulf %36, %38 : vector<16x32xf32>
      %c0_23 = arith.constant 0 : index
      %c0_24 = arith.constant 0 : index
      %40 = vector.load %arg7[%c0_23, %c0_24] : memref<1x32xf32, #tpu.memory_space<vmem>>, vector<1x32xf32>
      %41 = vector.broadcast %40 : vector<1x32xf32> to vector<16x32xf32>
      %42 = arith.addf %39, %41 : vector<16x32xf32>
      %43 = arith.truncf %42 : vector<16x32xf32> to vector<16x32xbf16>
      %c0_25 = arith.constant 0 : index
      %c0_26 = arith.constant 0 : index
      %44 = vector.load %arg8[%c0_25, %c0_26] : memref<16x32xbf16, #tpu.memory_space<vmem>>, vector<16x32xbf16>
      tpu.vector_store %arg8[%c0_25, %c0_26], %43 {strides = array<i32>} : memref<16x32xbf16, #tpu.memory_space<vmem>>, vector<16x32xbf16>,
    } else {
    }
    return
  }
  func.func @transform_0(%arg0: i32, %arg1: i32) -> (i32, i32) {
    %c0_i32 = arith.constant 0 : i32
    return %arg0, %arg1 : i32, i32
  }
  func.func @transform_1(%arg0: i32, %arg1: i32) -> (i32, i32) {
    %c0_i32 = arith.constant 0 : i32
    %c0_i32_0 = arith.constant 0 : i32
    return %arg1, %c0_i32 : i32, i32
  }
  func.func @transform_2(%arg0: i32, %arg1: i32) -> (i32, i32) {
    %c0_i32 = arith.constant 0 : i32
    %c0_i32_0 = arith.constant 0 : i32
    %c0_i32_1 = arith.constant 0 : i32
    return %c0_i32, %c0_i32_0 : i32, i32
  }
  func.func @transform_3(%arg0: i32, %arg1: i32) -> (i32, i32) {
    %c0_i32 = arith.constant 0 : i32
    %c0_i32_0 = arith.constant 0 : i32
    return %arg0, %c0_i32 : i32, i32
  }
  func.func @transform_4(%arg0: i32, %arg1: i32) -> (i32, i32) {
    %c0_i32 = arith.constant 0 : i32
    %c0_i32_0 = arith.constant 0 : i32
    %c0_i32_1 = arith.constant 0 : i32
    return %c0_i32, %c0_i32_0 : i32, i32
  }
  func.func @transform_5(%arg0: i32, %arg1: i32) -> (i32, i32) {
    %c0_i32 = arith.constant 0 : i32
    %c0_i32_0 = arith.constant 0 : i32
    %c0_i32_1 = arith.constant 0 : i32
    return %c0_i32, %c0_i32_0 : i32, i32
  }
  func.func @transform_6(%arg0: i32, %arg1: i32) -> (i32, i32) {
    %c0_i32 = arith.constant 0 : i32
    %c0_i32_0 = arith.constant 0 : i32
    return %arg0, %c0_i32 : i32, i32
  }
}

module attributes {stable_mosaic.version = 11 : i64} {
  func.func @_linear_kernel(%arg0: i32, %arg1: i32, %arg2: i32, %arg3: memref<16x128xbf16, #tpu.memory_space<vmem>>, %arg4: memref<128x128xbf16, #tpu.memory_space<vmem>>, %arg5: memref<1x128xf32, #tpu.memory_space<vmem>>, %arg6: memref<16x128xbf16, #tpu.memory_space<vmem>>, %arg7: memref<16x128xf32, #tpu.memory_space<vmem>>) attributes {dimension_semantics = [#tpu.dimension_semantics<parallel>, #tpu.dimension_semantics<parallel>, #tpu.dimension_semantics<arbitrary>], iteration_bounds = array<i64: 1, 1, 1>, scalar_prefetch = 0 : i64, scratch_operands = 1 : i64, tpu.core_type = #tpu.core_type<tc>, window_params = [{transform_indices = @transform_0, window_bounds = array<i64: 16, 128>}, {transform_indices = @transform_1, window_bounds = array<i64: 128, 128>}, {transform_indices = @transform_2, window_bounds = array<i64: 1, 128>}, {transform_indices = @transform_3, window_bounds = array<i64: 16, 128>}]} {
    %c0_i32 = arith.constant 0 : i32
    %0 = arith.cmpi eq, %arg2, %c0_i32 : i32
    %1 = arith.extui %0 : i1 to i32
    %c0_i32_0 = arith.constant 0 : i32
    %2 = arith.cmpi ne, %1, %c0_i32_0 : i32
    scf.if %2 {
      %cst_10 = arith.constant 0.000000e+00 : f32
      %12 = vector.broadcast %cst_10 : f32 to vector<16x128xf32>
      %c0_11 = arith.constant 0 : index
      %c0_12 = arith.constant 0 : index
      %13 = vector.load %arg7[%c0_11, %c0_12] : memref<16x128xf32, #tpu.memory_space<vmem>>, vector<16x128xf32>
      tpu.vector_store %arg7[%c0_11, %c0_12], %12 {strides = array<i32>} : memref<16x128xf32, #tpu.memory_space<vmem>>, vector<16x128xf32>,
    } else {
    }
    %c0 = arith.constant 0 : index
    %c0_1 = arith.constant 0 : index
    %3 = vector.load %arg7[%c0, %c0_1] : memref<16x128xf32, #tpu.memory_space<vmem>>, vector<16x128xf32>
    %c0_2 = arith.constant 0 : index
    %c0_3 = arith.constant 0 : index
    %4 = vector.load %arg3[%c0_2, %c0_3] : memref<16x128xbf16, #tpu.memory_space<vmem>>, vector<16x128xbf16>
    %c0_4 = arith.constant 0 : index
    %c0_5 = arith.constant 0 : index
    %5 = vector.load %arg4[%c0_4, %c0_5] : memref<128x128xbf16, #tpu.memory_space<vmem>>, vector<128x128xbf16>
    %cst = arith.constant dense<0.000000e+00> : vector<16x128xf32>
    %6 = tpu.matmul %4, %5, %cst {dimension_numbers = #tpu.dot_dimension_numbers<[1], [0], [0], [1], [0, 0, 1, 1], [], []>} : vector<16x128xbf16>, vector<128x128xbf16>, vector<16x128xf32> -> vector<16x128xf32>
    %7 = arith.addf %3, %6 : vector<16x128xf32>
    %c0_6 = arith.constant 0 : index
    %c0_7 = arith.constant 0 : index
    %8 = vector.load %arg7[%c0_6, %c0_7] : memref<16x128xf32, #tpu.memory_space<vmem>>, vector<16x128xf32>
    tpu.vector_store %arg7[%c0_6, %c0_7], %7 {strides = array<i32>} : memref<16x128xf32, #tpu.memory_space<vmem>>, vector<16x128xf32>,
    %c0_i32_8 = arith.constant 0 : i32
    %9 = arith.cmpi eq, %arg2, %c0_i32_8 : i32
    %10 = arith.extui %9 : i1 to i32
    %c0_i32_9 = arith.constant 0 : i32
    %11 = arith.cmpi ne, %10, %c0_i32_9 : i32
    scf.if %11 {
      %c0_10 = arith.constant 0 : index
      %c0_11 = arith.constant 0 : index
      %12 = vector.load %arg7[%c0_10, %c0_11] : memref<16x128xf32, #tpu.memory_space<vmem>>, vector<16x128xf32>
      %c0_12 = arith.constant 0 : index
      %c0_13 = arith.constant 0 : index
      %13 = vector.load %arg5[%c0_12, %c0_13] : memref<1x128xf32, #tpu.memory_space<vmem>>, vector<1x128xf32>
      %14 = vector.broadcast %13 : vector<1x128xf32> to vector<16x128xf32>
      %15 = arith.addf %12, %14 : vector<16x128xf32>
      %16 = arith.mulf %15, %15 : vector<16x128xf32>
      %17 = arith.mulf %15, %16 : vector<16x128xf32>
      %cst_14 = arith.constant 4.471500e-02 : f32
      %18 = vector.broadcast %cst_14 : f32 to vector<16x128xf32>
      %19 = arith.mulf %18, %17 : vector<16x128xf32>
      %20 = arith.addf %15, %19 : vector<16x128xf32>
      %cst_15 = arith.constant 0.797884583 : f32
      %21 = vector.broadcast %cst_15 : f32 to vector<16x128xf32>
      %22 = arith.mulf %21, %20 : vector<16x128xf32>
      %23 = math.tanh %22 : vector<16x128xf32>
      %cst_16 = arith.constant 1.000000e+00 : f32
      %24 = vector.broadcast %cst_16 : f32 to vector<16x128xf32>
      %25 = arith.addf %24, %23 : vector<16x128xf32>
      %cst_17 = arith.constant 5.000000e-01 : f32
      %26 = vector.broadcast %cst_17 : f32 to vector<16x128xf32>
      %27 = arith.mulf %26, %25 : vector<16x128xf32>
      %28 = arith.mulf %15, %27 : vector<16x128xf32>
      %29 = arith.truncf %28 : vector<16x128xf32> to vector<16x128xbf16>
      %c0_18 = arith.constant 0 : index
      %c0_19 = arith.constant 0 : index
      %30 = vector.load %arg6[%c0_18, %c0_19] : memref<16x128xbf16, #tpu.memory_space<vmem>>, vector<16x128xbf16>
      tpu.vector_store %arg6[%c0_18, %c0_19], %29 {strides = array<i32>} : memref<16x128xbf16, #tpu.memory_space<vmem>>, vector<16x128xbf16>,
    } else {
    }
    return
  }
  func.func @transform_0(%arg0: i32, %arg1: i32, %arg2: i32) -> (i32, i32) {
    %c0_i32 = arith.constant 0 : i32
    return %arg0, %arg2 : i32, i32
  }
  func.func @transform_1(%arg0: i32, %arg1: i32, %arg2: i32) -> (i32, i32) {
    %c0_i32 = arith.constant 0 : i32
    return %arg2, %arg1 : i32, i32
  }
  func.func @transform_2(%arg0: i32, %arg1: i32, %arg2: i32) -> (i32, i32) {
    %c0_i32 = arith.constant 0 : i32
    %c0_i32_0 = arith.constant 0 : i32
    return %c0_i32, %arg1 : i32, i32
  }
  func.func @transform_3(%arg0: i32, %arg1: i32, %arg2: i32) -> (i32, i32) {
    %c0_i32 = arith.constant 0 : i32
    return %arg0, %arg1 : i32, i32
  }
}

</mosaic_0001>

<bundles_post_ra>
// kernel: sa_linear_model_prune_forward.11
= control target key start
LH: loop header
LB: loop body
LE: loop exit
PB: predicated region body
PF: predicated region fallthrough
CT: control target
= control target key end

     0   :  { %vm16_vm0 = vcmask 261120   ;;  %vm70_vm1 = vcmask 257024   ;;  %s129_s0 = inlined_call_operand.vmem [shape: f32[16,32], index: 0, kind: input, shape index: {}]   ;;  %s130_s1 = inlined_call_operand.vmem [shape: f32[1,32], index: 1, kind: input, shape index: {}]   ;;  %s131_s2 = inlined_call_operand.vmem [shape: f32[1,32], index: 2, kind: input, shape index: {}]   ;;  %s132_s3 = inlined_call_operand.vmem [shape: bf16[16,32], index: 3, kind: output, shape index: {}]  }
   0x1   :  { %v14_v0 = vld [vmem:[%s129_s0] sm:$0xff]  ;;  %v15_v1 = vld [vmem:[%s129_s0 + $0x8] sm:$0xff] }
   0x2   :  { %v17_v2 = vsel %vm16_vm0, %v14_v0, 0.0  ;;  %v20_v3 = vsel %vm16_vm0, %v15_v1, 0.0  ;;  %v77_v21 = vld [vmem:[%s130_s1] ss:$0 sm:$0xff] }
   0x3   :  { %18 = vadd.xlane.f32.xlu0 %v17_v2  ;;  %v78_v23 = vld [vmem:[%s131_s2] ss:$0 sm:$0xff] }
   0x7   :  { %21 = vadd.xlane.f32.xlu0 %v20_v3 }
  0x90   :  { %v19_v4 = vpop.xlane.xlu0 %18 }
  0x91   :  { %v24_v5 = vmul.f32 0.03125, %v19_v4 }
  0x93   :  { %v26_v6 = vsub.f32 %v14_v0, %v24_v5 }
  0x94   :  { %v22_v7 = vpop.xlane.xlu0 %21 }
  0x95   :  { %v25_v8 = vmul.f32 0.03125, %v22_v7  ;;  %v28_v9 = vmul.f32 %v26_v6, %v26_v6 }
  0x97   :  { %v27_v10 = vsub.f32 %v15_v1, %v25_v8  ;;  %v30_v11 = vsel %vm16_vm0, %v28_v9, 0.0 }
  0x98   :  { %31 = vadd.xlane.f32.xlu1 %v30_v11 }
  0x99   :  { %v29_v12 = vmul.f32 %v27_v10, %v27_v10 }
  0x9b   :  { %v33_v13 = vsel %vm16_vm0, %v29_v12, 0.0 }
  0x9c   :  { %34 = vadd.xlane.f32.xlu1 %v33_v13 }
 0x125   :  { %v32_v14 = vpop.xlane.xlu1 %31 }
 0x126   :  { %v36_v15 = vmul.f32 0.03125, %v32_v14 }
 0x128   :  { %v38_v16 = vadd.f32 1e-12, %v36_v15 }
 0x129   :  { %v35_v17 = vpop.xlane.xlu1 %34 }
 0x12a   :  { %83 = vrsqrt.f32 %v38_v16  ;;  %v37_v18 = vmul.f32 0.03125, %v35_v17 }
 0x12c   :  { %v39_v19 = vadd.f32 1e-12, %v37_v18 }
 0x12e   :  { %85 = vrsqrt.f32 %v39_v19 }
 0x134   :  { %v84_v20 = vpop.eup %83 }
 0x135   :  { %v42_v22 = vmul.f32 %v84_v20, %v26_v6 }
 0x137   :  { %v51_v24 = vmul.f32 %v77_v21, %v42_v22 }
 0x138   :  { %v86_v25 = vpop.eup %85 }
 0x139   :  { %v60_v26 = vadd.f32 %v78_v23, %v51_v24  ;;  %v43_v27 = vmul.f32 %v86_v25, %v27_v10 }
 0x13b   :  { %v81_v28 = vpack.c.bf16 %v60_v26, %v60_v26  ;;  %v52_v29 = vmul.f32 %v77_v21, %v43_v27 }
 0x13d   :  { %71 = vst.msk [vmem:[%s132_s3] sm:$0xf] %vm70_vm1, %v81_v28  ;;  %v61_v30 = vadd.f32 %v78_v23, %v52_v29 }
 0x13f   :  { %v82_v31 = vpack.c.bf16 %v61_v30, %v61_v30 }
 0x141   :  { %72 = vst.msk [vmem:[%s132_s3 + $0x4] sm:$0xf] %vm70_vm1, %v82_v31 }

// kernel: sa_linear_model_prune_forward.12
= control target key start
LH: loop header
LB: loop body
LE: loop exit
PB: predicated region body
PF: predicated region fallthrough
CT: control target
= control target key end

     0   :  { %v227_v0 = vmov 0.0   ;;  %vm228_vm0 = vmmov 0   ;;  %s282_s1 = inlined_call_operand.vmem [shape: bf16[128,128], index: 1, kind: input, shape index: {}]   ;;  %s283_s0 = inlined_call_operand.vmem [shape: bf16[16,128], index: 0, kind: input, shape index: {}]   ;;  %s284_s2 = inlined_call_operand.vmem [shape: f32[1,128], index: 2, kind: input, shape index: {}]   ;;  %s285_s3 = inlined_call_operand.vmem [shape: bf16[16,128], index: 3, kind: output, shape index: {}]  }
   0x1   :  { %196 = vmatprep.subr.bf16.mxu0 %v227_v0  ;;  %v218_v1 = vld [vmem:[%s282_s1] sm:$0xff]   ;;  %212 = vmatprep.mubr.msk.bf16.mxu0 %vm228_vm0, %v227_v0  ;;  %v219_v2 = vld [vmem:[%s282_s1 + $0x8] sm:$0xff]   ;;  %v220_v3 = vld [vmem:[%s282_s1 + $0x10] sm:$0xff]  }
   0x2   :  { %197 = vmatpush3.bf16.msra.mxu0 %v218_v1  ;;  %v221_v4 = vld [vmem:[%s282_s1 + $0x18] sm:$0xff]   ;;  %v222_v5 = vld [vmem:[%s282_s1 + $0x20] sm:$0xff]   ;;  %v223_v6 = vld [vmem:[%s282_s1 + $0x28] sm:$0xff]  }
   0x3   :  { %198 = vmatprep.subr.bf16.mxu0 %v227_v0  ;;  %v224_v7 = vld [vmem:[%s282_s1 + $0x30] sm:$0xff]   ;;  %v225_v8 = vld [vmem:[%s282_s1 + $0x38] sm:$0xff]   ;;  %v226_v9 = vld [vmem:[%s283_s0] sm:$0xff]  }
   0x4   :  { %v177_v11 = vld [vmem:[%s284_s2] ss:$0 sm:$0xff] }
   0x6   :  { %199 = vmatpush3.bf16.msra.mxu0 %v219_v2 }
   0x7   :  { %200 = vmatprep.subr.bf16.mxu0 %v227_v0 }
   0xa   :  { %201 = vmatpush3.bf16.msra.mxu0 %v220_v3 }
   0xb   :  { %202 = vmatprep.subr.bf16.mxu0 %v227_v0 }
   0xe   :  { %203 = vmatpush3.bf16.msra.mxu0 %v221_v4 }
   0xf   :  { %204 = vmatprep.subr.bf16.mxu0 %v227_v0 }
  0x12   :  { %205 = vmatpush3.bf16.msra.mxu0 %v222_v5 }
  0x13   :  { %206 = vmatprep.subr.bf16.mxu0 %v227_v0 }
  0x16   :  { %207 = vmatpush3.bf16.msra.mxu0 %v223_v6 }
  0x17   :  { %208 = vmatprep.subr.bf16.mxu0 %v227_v0 }
  0x1a   :  { %209 = vmatpush3.bf16.msra.mxu0 %v224_v7 }
  0x1b   :  { %210 = vmatprep.subr.bf16.mxu0 %v227_v0 }
  0x1e   :  { %211 = vmatpush3.bf16.msra.mxu0 %v225_v8 }
  0x21   :  { %213 = vmatmul.mubr.bf16.vlgmr.msra.gmra.mrb[0].mxu0 %v226_v9 }
  0xf4   :  { %v129_v10 = vpop.f32.mrb[0].mxu0 }
  0xf5   :  { %v214_v12 = vpop.f32.mrb[1].mxu0  ;;  %v152_v14 = vadd.f32 %v177_v11, %v129_v10 }
  0xf6   :  { %v132_v13 = vpop.f32.mrb[2].mxu0 }
  0xf7   :  { %v153_v15 = vadd.f32 %v177_v11, %v132_v13  ;;  %v215_v16 = vpop.f32.mrb[3].mxu0 }
  0xf9   :  { %v185_v17 = vpack.c.bf16 %v153_v15, %v152_v14 }
  0xfb   :  { %186 = vst [vmem:[%s285_s3] sm:$0xff] %v185_v17  }

// kernel: sa_linear_model_prune_forward.13
= control target key start
LH: loop header
LB: loop body
LE: loop exit
PB: predicated region body
PF: predicated region fallthrough
CT: control target
= control target key end

     0   :  { %9 = vsyncpa [#allocation3], 0  ;;  %s1109_s15 = smov 0   ;;  %s1111_s16 = smov 0   ;;  %s1256_s0 = inlined_call_operand.vmem [shape: f32[4], index: 0, kind: input, shape index: {}]   ;;  %s1257_s1 = inlined_call_operand.vmem [shape: bf16[2,8,96], index: 1, kind: input, shape index: {}, may-alias: {1,2}]   ;;  %s1258_s2 = inlined_call_operand.vmem [shape: bf16[2,8,96], index: 2, kind: input, shape index: {}, may-alias: {1,2}]   ;;  %s1259_s3 = inlined_call_operand.vmem [shape: f32[2,1,8], index: 3, kind: input, shape index: {}]   ;;  %s1260_s4 = inlined_call_operand.vmem [shape: bf16[2,8,32], index: 4, kind: output, shape index: {}]  }
   0x1   :  { %s1113_s17 = smov 0  }
   0x2 LB: > { %s865_s18 = sadd.s32 4294967295, %s1065_s17   ;;  %s27_s19 = sadd.s32 1, %s1061_s16  ;;  %s1065_s17 = sphi %s1113_s17, %s15_s17   ;;  %s1061_s16 = sphi %s1111_s16, %s1264_s16   ;;  %s1057_s15 = sphi %s1109_s15, %s1263_s15  }
   0x3   : > { %p29_p0 = scmp.ge.s32.totalorder %s27_s19, 2  ;;  %p867_p1 = scmp.ge.s32.totalorder %s1065_s17, 1 }
   0x4   : > { %p161_p2 = scmp.lt.s32.totalorder %s1065_s17, 3  ;;  %p1134_p4 = scmp.eq.s32.totalorder %s865_s18, 0 }
   0x5   : > { %s1266_s19 = smov (%p29_p0, %s27_s19), 0  ;;  %s174_s24 = sshll.u32 %s1256_s0, 4  ;;  %s175_s24 = int_to_ptr.vmem [resolvable:$true] %s174_s24 }
   0x6   : > { %p1130_p3 = pnand %p867_p1, %p161_p2  ;;  %s1024_s25 = scalar_lea.vmem %s175_s24, 16 }
   0x7   : > { %p1025_p7 = scmp.ne.s32.totalorder %s175_s24, %s1024_s25  ;;  %p1032_p11 = scmp.lt.s32.totalorder %s175_s24, %s175_s24 }
   0x8   : > { %p959_p5 = pneg %p1130_p3  ;;  %p1033_p12 = scmp.lt.s32.totalorder %s1024_s25, %s1024_s25 }
   0xa   : > { %p960_p6 = pnand %p1134_p4, %p959_p5  ;;  %p1034_p13 = por %p1033_p12, %p1032_p11 }
   0xc   : > { %p1026_p8 = pneg %p960_p6 }
   0xe   : > { %p1027_p9 = pnand %p1026_p8, %p1025_p7 }
  0x10   : > { %p1028_p10 = pneg %p1027_p9 }
  0x12   : > { %p1035_p0 = pnand %p1034_p13, %p1028_p10 }
  0x14   : > { %1038 = shalt.err (!%p1035_p0)
}
  0x15   : > { %s1067_s26 = smov [#allocation2]   ;;  %210 = sbr.rel (%p1130_p3) target bundleno = 1265 (0x4f1), region = 36 }
  0x16   : > { %962 = dma.vmem_to_smem (!%p960_p6), %s175_s24, 16, %s1067_s26, [#allocation3]  }
  0x1c   : > { %1052 = dma.done.wait (%p1134_p4), [#allocation3], 16  }
  0x1d   : > { %1054 = vsyncadd (%p1134_p4), [#allocation3], 4294967280 }
  0x1e   : > { %216 = sfence }
  0x1f   : > { %p248_p1 = scmp.lt.s32.totalorder %s1057_s15, 1  ;;  %v1068_v0 = vmov 0.0   ;;  %vm1069_vm0 = vmmov 0   ;;  %s1070_s5 = smov 96   ;;  %vm284_vm1 = vcmask 64512   ;;  %vm346_vm2 = vcmask 1043456  }
  0x20   : > { %907 = vmatprep.subr.bf16.mxu0 %v1068_v0  ;;  %909 = vmatprep.mubr.msk.bf16.mxu0 %vm1069_vm0, %v1068_v0  ;;  %s1071_s9 = smov 64   ;;  %s1072_s10 = smov 88   ;;  %vm750_vm3 = vcmask 130048   ;;  %vm752_vm4 = vcmask 195584   ;;  %vm755_vm5 = vcmask 257024  }
  0x21   : > { %s1268_s15 = smov (!%p248_p1, %s1057_s15), 1  ;;  %913 = vmatprep.subr.bf16.mxu1 %v1068_v0  ;;  %915 = vmatprep.mubr.msk.bf16.mxu1 %vm1069_vm0, %v1068_v0  ;;  %s1073_s11 = smov 120  }
  0x22   : > { %s1162_s27 = sshll.u32 %s1268_s15, 2  ;;  %s1074_s12 = smov 80  }
  0x23   : > { %s258_s30 = scalar_lea.vmem %s1258_s2, %s1162_s27  ;;  %s254_s8 = scalar_lea.vmem %s1257_s1, %s1162_s27 }
  0x24   : > { %v1168_v1 = vld [vmem:[%s258_s30] ss:$0 sps:$4 sm:$0xff]   ;;  %s1075_s13 = smov 112   ;;  %s1076_s14 = smov 72  }
  0x25   : > { %282 = vrot.lane.b32.xlu0 %v1168_v1, %s1070_s5  ;;  %v271_v4 = vld [vmem:[%s254_s8] sm:$0xf]  ;;  %341 = vrot.lane.b32.xlu1 %v1168_v1, %s1071_s9  ;;  %s1077_s18 = smov 104   ;;  %s261_s22 = scalar_lea.vmem %s1259_s3, %s1268_s15 }
  0x26   : > { %v879_v5 = vcombine.low %v271_v4, %v271_v4  ;;  %v1188_v6 = vld [vmem:[%s261_s22] ss:$0 sm:$0xff]  ;;  %s1078_s23 = smov 56   ;;  %s1079_s15 = smov 48  }
  0x27   : > { %s1080_s24 = smov 40   ;;  %s882_s25 = sld [smem:[#allocation2 + $0x1]] }
  0x28   : > { %s885_s26 = sld [smem:[#allocation2 + $0x2]]  ;;  %s1081_s28 = smov 8  }
  0x29   : > { %400 = vrot.lane.b32.xlu1 %v1168_v1, %s1072_s10  ;;  %s888_s29 = sld [smem:[#allocation2 + $0x3]]  ;;  %s1082_s30 = smov 16  }
  0x2a   : > { %s1083_s5 = smov 24   ;;  %s390_s6 = sld [smem:[#allocation2]] }
  0x2b   : > { %s268_s9 = scalar_lea.vmem %s1260_s4, %s1162_s27 }
  0x2d   : > { %398 = vrot.lane.b32.xlu1 %v879_v5, %s1073_s11 }
  0x31   : > { %513 = vrot.lane.b32.xlu1 %v1168_v1, %s1074_s12 }
  0x35   : > { %511 = vrot.lane.b32.xlu1 %v879_v5, %s1075_s13 }
  0x39   : > { %626 = vrot.lane.b32.xlu1 %v1168_v1, %s1076_s14 }
  0x3d   : > { %624 = vrot.lane.b32.xlu1 %v879_v5, %s1077_s18 }
  0x97   : > { %v283_v2 = vpop.permute.xlu0 %282  ;;  %v342_v13 = vpop.permute.xlu1 %341 }
  0x98   : > { %v289_v3 = vsel %vm284_vm1, %v283_v2, 0  ;;  %v348_v14 = vsel %vm346_vm2, %v342_v13, 0 }
  0x99   : > { %908 = vmatpush3.bf16.xpose.msra.mxu0 %v289_v3  ;;  %914 = vmatpush3.bf16.msra.mxu1 %v348_v14 }
  0x9a   : > { %925 = vmatprep.subr.bf16.mxu0 %v1068_v0  ;;  %919 = vmatprep.subr.bf16.mxu1 %v1068_v0 }
  0x9b   : > { %v401_v18 = vpop.permute.xlu1 %400 }
  0x9c   : > { %v406_v21 = vsel %vm284_vm1, %v401_v18, 0 }
  0x9f   : > { %v399_v19 = vpop.permute.xlu1 %398 }
  0xa0   : > { %910 = vmatmul.mubr.msk.bf16.vlgmr.msra.gmra.mrb[0].mxu0 %vm284_vm1, %v271_v4 }
  0xa1   : > { %927 = vmatprep.mubr.msk.bf16.mxu0 %vm1069_vm0, %v1068_v0 }
  0xa3   : > { %v514_v23 = vpop.permute.xlu1 %513 }
  0xa4   : > { %v519_v25 = vsel %vm284_vm1, %v514_v23, 0 }
  0xa7   : > { %v512_v24 = vpop.permute.xlu1 %511 }
  0xab   : > { %v627_v26 = vpop.permute.xlu1 %626 }
  0xac   : > { %v632_v27 = vsel %vm284_vm1, %v627_v26, 0 }
  0xaf   : > { %v625_v28 = vpop.permute.xlu1 %624 }
 0x173   : > { %v325_v7 = vpop.f32.mrb[0].mxu0 }
 0x174   : > { %v326_v8 = vadd.f32 %v1188_v6, %v325_v7  ;;  %v911_v9 = vpop.f32.mrb[1].mxu0 }
 0x175   : > { %v328_v10 = vpop.f32.mrb[2].mxu0 }
 0x176   : > { %v912_v11 = vpop.f32.mrb[3].mxu0  ;;  %v331_v12 = vsel %vm284_vm1, %v326_v8, -inf }
 0x177   : > { %332 = vmax.xlane.f32.xlu0 %v331_v12 }
 0x18d   : > { %458 = vrot.lane.b32.xlu0 %v1168_v1, %s1078_s23 }
 0x204   : > { %v333_v15 = vpop.xlane.xlu0 %332 }
 0x205   : > { %v334_v16 = vsub.f32 %v326_v8, %v333_v15 }
 0x207   : > { %v335_v17 = vmul.f32 1.442695, %v334_v16  ;;  %v508_v16 = vstv %s882_s25 }
 0x208   : > { %v459_v29 = vpop.permute.xlu0 %458 }
 0x209   : > { %1008 = vpow2.f32 %v335_v17  ;;  %v464_v30 = vsel %vm346_vm2, %v459_v29, 0 }
 0x20a   : > { %926 = vmatpush3.bf16.msra.mxu0 %v464_v30 }
 0x20b   : > { %937 = vmatprep.subr.bf16.mxu0 %v1068_v0 }
 0x213   : > { %v1195_v20 = vpop.eup %1008 }
 0x214   : > { %v340_v22 = vpack.c.bf16 %v1195_v20, %v1195_v20  ;;  %v337_v12 = vsel %vm284_vm1, %v1195_v20, 0.0 }
 0x216   : > { %916 = vmatmul.mubr.msk.bf16.vlgmr.msra.gmra.mrb[0].mxu1 %vm284_vm1, %v340_v22 }
 0x217   : > { %920 = vmatpush3.bf16.xpose.msra.mxu1 %v406_v21  ;;  %921 = vmatprep.mubr.msk.bf16.mxu1 %vm1069_vm0, %v1068_v0 }
 0x218   : > { %931 = vmatprep.subr.bf16.mxu1 %v1068_v0 }
 0x21e   : > { %922 = vmatmul.mubr.msk.bf16.vlgmr.msra.gmra.mrb[4].mxu1 %vm284_vm1, %v399_v19 }
 0x21f   : > { %932 = vmatpush3.bf16.xpose.msra.mxu1 %v519_v25  ;;  %933 = vmatprep.mubr.msk.bf16.mxu1 %vm1069_vm0, %v1068_v0 }
 0x220   : > { %943 = vmatprep.subr.bf16.mxu1 %v1068_v0 }
 0x226   : > { %934 = vmatmul.mubr.msk.bf16.vlgmr.msra.gmra.mrb[8].mxu1 %vm284_vm1, %v512_v24  ;;  %v621_v24 = vstv %s885_s26 }
 0x227   : > { %944 = vmatpush3.bf16.xpose.msra.mxu1 %v632_v27  ;;  %945 = vmatprep.mubr.msk.bf16.mxu1 %vm1069_vm0, %v1068_v0 }
 0x22e   : > { %946 = vmatmul.mubr.msk.bf16.vlgmr.msra.gmra.mrb[12].mxu1 %vm284_vm1, %v625_v28 }
 0x2e9   : > { %v1216_v31 = vpop.f32.mrb[0].mxu1 }
 0x2ea   : > { %v917_v32 = vpop.f32.mrb[1].mxu1 }
 0x2eb   : > { %v387_v33 = vpop.f32.mrb[2].mxu1 }
 0x2ec   : > { %v918_v34 = vpop.f32.mrb[3].mxu1  ;;  %v734_v33 = vstv %s888_s29 }
 0x2f1   : > { %v442_v35 = vpop.f32.mrb[4].mxu1 }
 0x2f2   : > { %v443_v36 = vadd.f32 %v1188_v6, %v442_v35  ;;  %v923_v37 = vpop.f32.mrb[5].mxu1 }
 0x2f3   : > { %v445_v38 = vpop.f32.mrb[6].mxu1 }
 0x2f4   : > { %v924_v39 = vpop.f32.mrb[7].mxu1  ;;  %v448_v40 = vsel %vm284_vm1, %v443_v36, -inf }
 0x2f5   : > { %449 = vmax.xlane.f32.xlu1 %v448_v40 }
 0x2f9   : > { %v555_v41 = vpop.f32.mrb[8].mxu1 }
 0x2fa   : > { %v556_v42 = vadd.f32 %v1188_v6, %v555_v41  ;;  %v935_v43 = vpop.f32.mrb[9].mxu1 }
 0x2fb   : > { %v558_v44 = vpop.f32.mrb[10].mxu1 }
 0x2fc   : > { %v936_v45 = vpop.f32.mrb[11].mxu1  ;;  %v561_v46 = vsel %vm284_vm1, %v556_v42, -inf }
 0x2fd   : > { %562 = vmax.xlane.f32.xlu0 %v561_v46 }
 0x301   : > { %v668_v47 = vpop.f32.mrb[12].mxu1 }
 0x302   : > { %v669_v48 = vadd.f32 %v1188_v6, %v668_v47  ;;  %v947_v49 = vpop.f32.mrb[13].mxu1 }
 0x303   : > { %v671_v50 = vpop.f32.mrb[14].mxu1 }
 0x304   : > { %v948_v51 = vpop.f32.mrb[15].mxu1  ;;  %v674_v52 = vsel %vm284_vm1, %v669_v48, -inf }
 0x305   : > { %675 = vmax.xlane.f32.xlu0 %v674_v52 }
 0x306   : > { %571 = vrot.lane.b32.xlu1 %v1168_v1, %s1079_s15 }
 0x31b   : > { %684 = vrot.lane.b32.xlu0 %v1168_v1, %s1080_s24 }
 0x382   : > { %v450_v53 = vpop.xlane.xlu1 %449 }
 0x383   : > { %v451_v54 = vsub.f32 %v443_v36, %v450_v53 }
 0x385   : > { %v452_v55 = vmul.f32 1.442695, %v451_v54 }
 0x386   : > { %v572_v59 = vpop.permute.xlu1 %571 }
 0x387   : > { %1010 = vpow2.f32 %v452_v55  ;;  %v577_v61 = vsel %vm346_vm2, %v572_v59, 0 }
 0x38a   : > { %v563_v56 = vpop.xlane.xlu0 %562 }
 0x38b   : > { %v564_v57 = vsub.f32 %v556_v42, %v563_v56  ;;  %v392_v42 = vstv %s390_s6 }
 0x38d   : > { %v565_v58 = vmul.f32 1.442695, %v564_v57 }
 0x38f   : > { %1012 = vpow2.f32 %v565_v58 }
 0x391   : > { %v1011_v60 = vpop.eup %1010 }
 0x392   : > { %v676_v62 = vpop.xlane.xlu0 %675  ;;  %v454_v63 = vsel %vm284_vm1, %v1011_v60, 0.0  ;;  %v457_v2 = vpack.c.bf16 %v1011_v60, %v1011_v60 }
 0x393   : > { %v677_v3 = vsub.f32 %v669_v48, %v676_v62  ;;  %455 = vadd.xlane.f32.xlu0 %v454_v63 }
 0x394   : > { %928 = vmatmul.mubr.msk.bf16.vlgmr.msra.gmra.mrb[4].mxu0 %vm284_vm1, %v457_v2 }
 0x395   : > { %v678_v1 = vmul.f32 1.442695, %v677_v3  ;;  %938 = vmatpush3.bf16.msra.mxu0 %v577_v61  ;;  %939 = vmatprep.mubr.msk.bf16.mxu0 %vm1069_vm0, %v1068_v0 }
 0x396   : > { %949 = vmatprep.subr.bf16.mxu0 %v1068_v0  ;;  %v685_v4 = vpop.permute.xlu0 %684 }
 0x397   : > { %1014 = vpow2.f32 %v678_v1  ;;  %v690_v6 = vsel %vm346_vm2, %v685_v4, 0 }
 0x399   : > { %v1013_v5 = vpop.eup %1012 }
 0x39a   : > { %v567_v7 = vsel %vm284_vm1, %v1013_v5, 0.0  ;;  %v570_v8 = vpack.c.bf16 %v1013_v5, %v1013_v5 }
 0x39b   : > { %568 = vadd.xlane.f32.xlu1 %v567_v7 }
 0x39c   : > { %940 = vmatmul.mubr.msk.bf16.vlgmr.msra.gmra.mrb[8].mxu0 %vm284_vm1, %v570_v8 }
 0x39d   : > { %950 = vmatpush3.bf16.msra.mxu0 %v690_v6  ;;  %951 = vmatprep.mubr.msk.bf16.mxu0 %vm1069_vm0, %v1068_v0 }
 0x3a1   : > { %v1015_v9 = vpop.eup %1014 }
 0x3a2   : > { %v680_v10 = vsel %vm284_vm1, %v1015_v9, 0.0  ;;  %v683_v11 = vpack.c.bf16 %v1015_v9, %v1015_v9 }
 0x3a3   : > { %681 = vadd.xlane.f32.xlu0 %v680_v10 }
 0x3a4   : > { %952 = vmatmul.mubr.msk.bf16.vlgmr.msra.gmra.mrb[12].mxu0 %vm284_vm1, %v683_v11 }
 0x3a7   : > { %338 = vadd.xlane.f32.xlu0 %v337_v12 }
 0x420   : > { %v456_v13 = vpop.xlane.xlu0 %455 }
 0x421   : > { %1016 = vrcp.f32 %v456_v13 }
 0x428   : > { %v569_v14 = vpop.xlane.xlu1 %568 }
 0x429   : > { %1018 = vrcp.f32 %v569_v14 }
 0x42b   : > { %v1017_v15 = vpop.eup %1016 }
 0x42c   : > { %v509_v17 = vmul.f32 %v1017_v15, %v508_v16 }
 0x430   : > { %v682_v0 = vpop.xlane.xlu0 %681 }
 0x431   : > { %1020 = vrcp.f32 %v682_v0 }
 0x433   : > { %v1019_v20 = vpop.eup %1018 }
 0x434   : > { %v622_v25 = vmul.f32 %v1019_v20, %v621_v24  ;;  %v339_v40 = vpop.xlane.xlu0 %338 }
 0x435   : > { %1022 = vrcp.f32 %v339_v40 }
 0x43b   : > { %v1021_v32 = vpop.eup %1020 }
 0x43c   : > { %v735_v34 = vmul.f32 %v1021_v32, %v734_v33 }
 0x43f   : > { %v1023_v41 = vpop.eup %1022 }
 0x440   : > { %v393_v43 = vmul.f32 %v1023_v41, %v392_v42 }
 0x442   : > { %v394_v45 = vmul.f32 %v393_v43, %v1216_v31 }
 0x467   : > { %v500_v18 = vpop.f32.mrb[4].mxu0 }
 0x468   : > { %v510_v19 = vmul.f32 %v509_v17, %v500_v18  ;;  %v929_v21 = vpop.f32.mrb[5].mxu0 }
 0x469   : > { %v503_v22 = vpop.f32.mrb[6].mxu0 }
 0x46a   : > { %738 = vrot.lane.b32.xlu0 %v510_v19, %s1081_s28  ;;  %v930_v23 = vpop.f32.mrb[7].mxu0 }
 0x46f   : > { %v613_v26 = vpop.f32.mrb[8].mxu0 }
 0x470   : > { %v623_v27 = vmul.f32 %v622_v25, %v613_v26  ;;  %v941_v28 = vpop.f32.mrb[9].mxu0 }
 0x471   : > { %v616_v29 = vpop.f32.mrb[10].mxu0 }
 0x472   : > { %742 = vrot.lane.b32.xlu1 %v623_v27, %s1082_s30  ;;  %v942_v30 = vpop.f32.mrb[11].mxu0 }
 0x477   : > { %v726_v35 = vpop.f32.mrb[12].mxu0 }
 0x478   : > { %v736_v36 = vmul.f32 %v735_v34, %v726_v35  ;;  %v953_v37 = vpop.f32.mrb[13].mxu0 }
 0x479   : > { %v729_v38 = vpop.f32.mrb[14].mxu0 }
 0x47a   : > { %746 = vrot.lane.b32.xlu0 %v736_v36, %s1083_s5  ;;  %v954_v39 = vpop.f32.mrb[15].mxu0 }
 0x4dc   : > { %v739_v44 = vpop.permute.xlu0 %738 }
 0x4dd   : > { %v749_v47 = vsel %vm284_vm1, %v394_v45, %v739_v44 }
 0x4e4   : > { %v743_v46 = vpop.permute.xlu1 %742 }
 0x4e5   : > { %v751_v48 = vsel %vm750_vm3, %v749_v47, %v743_v46 }
 0x4ec   : > { %v747_v49 = vpop.permute.xlu0 %746 }
 0x4ed   : > { %v753_v50 = vsel %vm752_vm4, %v751_v48, %v747_v49 }
 0x4ee   : > { %v754_v51 = vpack.c.bf16 %v753_v50, %v753_v50 }
 0x4f0   : > { %756 = vst.msk [vmem:[%s268_s9] sm:$0xf] %vm755_vm5, %v754_v51 }
 0x4f1 PF: > { %s15_s17 = sadd.s32 1, %s1065_s17   ;;  %s1263_s15 = smov %s1061_s16 }
 0x4f2   : > { %p12_p2 = scmp.ge.s32.totalorder %s15_s17, 4   ;;  %s1264_s16 = smov %s1266_s19 }
 0x4f4   :  { %14 = sbr.rel (!%p12_p2) target bundleno = 2 (0x2), region = 77 }
 0x4fb   :  { %782 = vsyncpa [#allocation3], 1 }
 0x4fc   :  { %784 = vsyncpa [#allocation3 + $0x1], 1 }

// kernel: sa_linear_model_prune_forward.14
= control target key start
LH: loop header
LB: loop body
LE: loop exit
PB: predicated region body
PF: predicated region fallthrough
CT: control target
= control target key end

     0   :  { %vm28_vm0 = vcmask 261120   ;;  %v295_v0 = vmov 0.0   ;;  %vm296_vm1 = vmmov 0   ;;  %vm224_vm2 = vcmask 257024   ;;  %s385_s1 = inlined_call_operand.vmem [shape: bf16[128,32], index: 1, kind: input, shape index: {}]   ;;  %s386_s0 = inlined_call_operand.vmem [shape: bf16[16,128], index: 0, kind: input, shape index: {}]   ;;  %s387_s3 = inlined_call_operand.vmem [shape: bf16[16,32], index: 3, kind: input, shape index: {}]   ;;  %s388_s2 = inlined_call_operand.vmem [shape: f32[1,32], index: 2, kind: input, shape index: {}]   ;;  %s389_s4 = inlined_call_operand.vmem [shape: f32[1,32], index: 4, kind: input, shape index: {}]   ;;  %s390_s5 = inlined_call_operand.vmem [shape: f32[1,32], index: 5, kind: input, shape index: {}]   ;;  %s391_s6 = inlined_call_operand.vmem [shape: bf16[16,32], index: 6, kind: output, shape index: {}]  }
   0x1   :  { %260 = vmatprep.subr.bf16.mxu0 %v295_v0  ;;  %v282_v1 = vld [vmem:[%s385_s1] sm:$0xff]   ;;  %276 = vmatprep.mubr.msk.bf16.mxu0 %vm296_vm1, %v295_v0  ;;  %29 = vst.msk [vmem:[#allocation2] sm:$0xff] %vm28_vm0, %v295_v0  ;;  %30 = vst.msk [vmem:[#allocation2 + $0x8] sm:$0xff] %vm28_vm0, %v295_v0  ;;  %v283_v2 = vld [vmem:[%s385_s1 + $0x8] sm:$0xff]  }
   0x2   :  { %261 = vmatpush3.bf16.msra.mxu0 %v282_v1  ;;  %v284_v3 = vld [vmem:[%s385_s1 + $0x10] sm:$0xff]   ;;  %v285_v4 = vld [vmem:[%s385_s1 + $0x18] sm:$0xff]   ;;  %v286_v5 = vld [vmem:[%s385_s1 + $0x20] sm:$0xff]  }
   0x3   :  { %262 = vmatprep.subr.bf16.mxu0 %v295_v0  ;;  %v287_v6 = vld [vmem:[%s385_s1 + $0x28] sm:$0xff]   ;;  %v288_v7 = vld [vmem:[%s385_s1 + $0x30] sm:$0xff]   ;;  %v289_v8 = vld [vmem:[%s385_s1 + $0x38] sm:$0xff]  }
   0x4   :  { %v290_v9 = vld [vmem:[%s386_s0] sm:$0xff]  }
   0x5   :  { %v248_v18 = vld [vmem:[%s387_s3] sm:$0xff]  }
   0x6   :  { %263 = vmatpush3.bf16.msra.mxu0 %v283_v2  ;;  %v240_v19 = vld [vmem:[%s388_s2] ss:$0 sm:$0xff]  ;;  %v249_v20 = vunpack.c.l.bf16 %v248_v18  ;;  %v250_v23 = vunpack.c.h.bf16 %v248_v18 }
   0x7   :  { %264 = vmatprep.subr.bf16.mxu0 %v295_v0  ;;  %v241_v47 = vld [vmem:[%s389_s4] ss:$0 sm:$0xff] }
   0x8   :  { %v31_v10 = vld [vmem:[#allocation2] sm:$0xff]  ;;  %v32_v12 = vld [vmem:[#allocation2 + $0x8] sm:$0xff] }
   0x9   :  { %v242_v49 = vld [vmem:[%s390_s5] ss:$0 sm:$0xff] }
   0xa   :  { %265 = vmatpush3.bf16.msra.mxu0 %v284_v3 }
   0xb   :  { %266 = vmatprep.subr.bf16.mxu0 %v295_v0 }
   0xe   :  { %267 = vmatpush3.bf16.msra.mxu0 %v285_v4 }
   0xf   :  { %268 = vmatprep.subr.bf16.mxu0 %v295_v0 }
  0x12   :  { %269 = vmatpush3.bf16.msra.mxu0 %v286_v5 }
  0x13   :  { %270 = vmatprep.subr.bf16.mxu0 %v295_v0 }
  0x16   :  { %271 = vmatpush3.bf16.msra.mxu0 %v287_v6 }
  0x17   :  { %272 = vmatprep.subr.bf16.mxu0 %v295_v0 }
  0x1a   :  { %273 = vmatpush3.bf16.msra.mxu0 %v288_v7 }
  0x1b   :  { %274 = vmatprep.subr.bf16.mxu0 %v295_v0 }
  0x1e   :  { %275 = vmatpush3.bf16.msra.mxu0 %v289_v8 }
  0x21   :  { %277 = vmatmul.mubr.bf16.vlgmr.msra.gmra.mrb[0].mxu0 %v290_v9 }
  0xf4   :  { %v139_v11 = vpop.f32.mrb[0].mxu0 }
  0xf5   :  { %v146_v13 = vadd.f32 %v139_v11, %v31_v10  ;;  %v278_v14 = vpop.f32.mrb[1].mxu0 }
  0xf6   :  { %v142_v15 = vpop.f32.mrb[2].mxu0 }
  0xf7   :  { %149 = vst.msk [vmem:[#allocation2] sm:$0xff] %vm28_vm0, %v146_v13  ;;  %v147_v16 = vadd.f32 %v142_v15, %v32_v12  ;;  %v279_v17 = vpop.f32.mrb[3].mxu0 }
  0xf9   :  { %150 = vst.msk [vmem:[#allocation2 + $0x8] sm:$0xff] %vm28_vm0, %v147_v16 }
  0xfe   :  { %v154_v21 = vld [vmem:[#allocation2] sm:$0xff] }
  0xff   :  { %v163_v22 = vadd.f32 %v240_v19, %v154_v21 }
 0x100   :  { %v155_v24 = vld [vmem:[#allocation2 + $0x8] sm:$0xff] }
 0x101   :  { %v169_v25 = vadd.f32 %v249_v20, %v163_v22  ;;  %v164_v26 = vadd.f32 %v240_v19, %v155_v24 }
 0x103   :  { %v171_v27 = vsel %vm28_vm0, %v169_v25, 0.0  ;;  %v170_v28 = vadd.f32 %v250_v23, %v164_v26 }
 0x104   :  { %172 = vadd.xlane.f32.xlu0 %v171_v27 }
 0x105   :  { %v174_v29 = vsel %vm28_vm0, %v170_v28, 0.0 }
 0x108   :  { %175 = vadd.xlane.f32.xlu0 %v174_v29 }
 0x191   :  { %v173_v30 = vpop.xlane.xlu0 %172 }
 0x192   :  { %v178_v31 = vmul.f32 0.03125, %v173_v30 }
 0x194   :  { %v180_v32 = vsub.f32 %v169_v25, %v178_v31 }
 0x195   :  { %v176_v33 = vpop.xlane.xlu0 %175 }
 0x196   :  { %v179_v34 = vmul.f32 0.03125, %v176_v33  ;;  %v182_v35 = vmul.f32 %v180_v32, %v180_v32 }
 0x198   :  { %v181_v36 = vsub.f32 %v170_v28, %v179_v34  ;;  %v184_v37 = vsel %vm28_vm0, %v182_v35, 0.0 }
 0x199   :  { %185 = vadd.xlane.f32.xlu1 %v184_v37 }
 0x19a   :  { %v183_v38 = vmul.f32 %v181_v36, %v181_v36 }
 0x19c   :  { %v187_v39 = vsel %vm28_vm0, %v183_v38, 0.0 }
 0x19d   :  { %188 = vadd.xlane.f32.xlu1 %v187_v39 }
 0x226   :  { %v186_v40 = vpop.xlane.xlu1 %185 }
 0x227   :  { %v190_v41 = vmul.f32 0.03125, %v186_v40 }
 0x229   :  { %v192_v42 = vadd.f32 1e-12, %v190_v41 }
 0x22a   :  { %v189_v43 = vpop.xlane.xlu1 %188 }
 0x22b   :  { %291 = vrsqrt.f32 %v192_v42  ;;  %v191_v44 = vmul.f32 0.03125, %v189_v43 }
 0x22d   :  { %v193_v45 = vadd.f32 1e-12, %v191_v44 }
 0x22f   :  { %293 = vrsqrt.f32 %v193_v45 }
 0x235   :  { %v292_v46 = vpop.eup %291 }
 0x236   :  { %v196_v48 = vmul.f32 %v292_v46, %v180_v32 }
 0x238   :  { %v205_v50 = vmul.f32 %v241_v47, %v196_v48 }
 0x239   :  { %v294_v51 = vpop.eup %293 }
 0x23a   :  { %v214_v52 = vadd.f32 %v242_v49, %v205_v50  ;;  %v197_v53 = vmul.f32 %v294_v51, %v181_v36 }
 0x23c   :  { %v245_v54 = vpack.c.bf16 %v214_v52, %v214_v52  ;;  %v206_v55 = vmul.f32 %v241_v47, %v197_v53 }
 0x23e   :  { %225 = vst.msk [vmem:[%s391_s6] sm:$0xf] %vm224_vm2, %v245_v54  ;;  %v215_v56 = vadd.f32 %v242_v49, %v206_v55 }
 0x240   :  { %v246_v57 = vpack.c.bf16 %v215_v56, %v215_v56 }
 0x242   :  { %226 = vst.msk [vmem:[%s391_s6 + $0x4] sm:$0xf] %vm224_vm2, %v246_v57 }

// kernel: sa_linear_model_prune_forward.15
= control target key start
LH: loop header
LB: loop body
LE: loop exit
PB: predicated region body
PF: predicated region fallthrough
CT: control target
= control target key end

     0   :  { %v249_v0 = vmov 0.0   ;;  %vm250_vm0 = vmmov 0   ;;  %s304_s1 = inlined_call_operand.vmem [shape: bf16[128,128], index: 1, kind: input, shape index: {}]   ;;  %s305_s0 = inlined_call_operand.vmem [shape: bf16[16,128], index: 0, kind: input, shape index: {}]   ;;  %s306_s2 = inlined_call_operand.vmem [shape: f32[1,128], index: 2, kind: input, shape index: {}]   ;;  %s307_s3 = inlined_call_operand.vmem [shape: bf16[16,128], index: 3, kind: output, shape index: {}]  }
   0x1   :  { %214 = vmatprep.subr.bf16.mxu0 %v249_v0  ;;  %v236_v1 = vld [vmem:[%s304_s1] sm:$0xff]   ;;  %230 = vmatprep.mubr.msk.bf16.mxu0 %vm250_vm0, %v249_v0  ;;  %v237_v2 = vld [vmem:[%s304_s1 + $0x8] sm:$0xff]   ;;  %v238_v3 = vld [vmem:[%s304_s1 + $0x10] sm:$0xff]  }
   0x2   :  { %215 = vmatpush3.bf16.msra.mxu0 %v236_v1  ;;  %v239_v4 = vld [vmem:[%s304_s1 + $0x18] sm:$0xff]   ;;  %v240_v5 = vld [vmem:[%s304_s1 + $0x20] sm:$0xff]   ;;  %v241_v6 = vld [vmem:[%s304_s1 + $0x28] sm:$0xff]  }
   0x3   :  { %216 = vmatprep.subr.bf16.mxu0 %v249_v0  ;;  %v242_v7 = vld [vmem:[%s304_s1 + $0x30] sm:$0xff]   ;;  %v243_v8 = vld [vmem:[%s304_s1 + $0x38] sm:$0xff]   ;;  %v244_v9 = vld [vmem:[%s305_s0] sm:$0xff]  }
   0x4   :  { %v195_v10 = vld [vmem:[%s306_s2] ss:$0 sm:$0xff] }
   0x6   :  { %217 = vmatpush3.bf16.msra.mxu0 %v237_v2 }
   0x7   :  { %218 = vmatprep.subr.bf16.mxu0 %v249_v0 }
   0xa   :  { %219 = vmatpush3.bf16.msra.mxu0 %v238_v3 }
   0xb   :  { %220 = vmatprep.subr.bf16.mxu0 %v249_v0 }
   0xe   :  { %221 = vmatpush3.bf16.msra.mxu0 %v239_v4 }
   0xf   :  { %222 = vmatprep.subr.bf16.mxu0 %v249_v0 }
  0x12   :  { %223 = vmatpush3.bf16.msra.mxu0 %v240_v5 }
  0x13   :  { %224 = vmatprep.subr.bf16.mxu0 %v249_v0 }
  0x16   :  { %225 = vmatpush3.bf16.msra.mxu0 %v241_v6 }
  0x17   :  { %226 = vmatprep.subr.bf16.mxu0 %v249_v0 }
  0x1a   :  { %227 = vmatpush3.bf16.msra.mxu0 %v242_v7 }
  0x1b   :  { %228 = vmatprep.subr.bf16.mxu0 %v249_v0 }
  0x1e   :  { %229 = vmatpush3.bf16.msra.mxu0 %v243_v8 }
  0x21   :  { %231 = vmatmul.mubr.bf16.vlgmr.msra.gmra.mrb[0].mxu0 %v244_v9 }
  0xf4   :  { %v129_v11 = vpop.f32.mrb[0].mxu0 }
  0xf5   :  { %v152_v12 = vadd.f32 %v195_v10, %v129_v11  ;;  %v232_v13 = vpop.f32.mrb[1].mxu0 }
  0xf6   :  { %v132_v14 = vpop.f32.mrb[2].mxu0 }
  0xf7   :  { %v154_v15 = vmul.f32 %v152_v12, %v152_v12  ;;  %v153_v16 = vadd.f32 %v195_v10, %v132_v14  ;;  %v233_v17 = vpop.f32.mrb[3].mxu0 }
  0xf9   :  { %v156_v18 = vmul.f32 %v154_v15, %v152_v12  ;;  %v155_v19 = vmul.f32 %v153_v16, %v153_v16 }
  0xfb   :  { %v158_v20 = vmul.f32 0.044715, %v156_v18  ;;  %v157_v21 = vmul.f32 %v155_v19, %v153_v16 }
  0xfd   :  { %v160_v22 = vadd.f32 %v158_v20, %v152_v12  ;;  %v159_v23 = vmul.f32 0.044715, %v157_v21 }
  0xff   :  { %v162_v24 = vmul.f32 0.7978846, %v160_v22  ;;  %v161_v25 = vadd.f32 %v159_v23, %v153_v16 }
 0x101   :  { %245 = vtanh.f32 %v162_v24  ;;  %v163_v26 = vmul.f32 0.7978846, %v161_v25 }
 0x103   :  { %247 = vtanh.f32 %v163_v26 }
 0x10b   :  { %v246_v27 = vpop.eup %245 }
 0x10c   :  { %v166_v28 = vadd.f32 1.0, %v246_v27 }
 0x10d   :  { %v248_v29 = vpop.eup %247 }
 0x10e   :  { %v168_v30 = vmul.f32 0.5, %v166_v28  ;;  %v167_v31 = vadd.f32 1.0, %v248_v29 }
 0x110   :  { %v169_v32 = vmul.f32 0.5, %v167_v31  ;;  %v170_v33 = vmul.f32 %v168_v30, %v152_v12 }
 0x112   :  { %v171_v34 = vmul.f32 %v169_v32, %v153_v16 }
 0x114   :  { %v203_v35 = vpack.c.bf16 %v171_v34, %v170_v33 }
 0x116   :  { %204 = vst [vmem:[%s307_s3] sm:$0xff] %v203_v35  }

</bundles_post_ra>
